<compile_context>
chip_gen: v7x
topology: tpu7x:2x2x1
jax: 0.10.0
libtpu: 0.0.40
codegen_flags: <defaults>
</compile_context>

<pallas_src>
import functools

import jax
import jax.numpy as jnp
import numpy as np
from jax.experimental import pallas as pl
from jax.experimental.pallas import tpu as pltpu


def routing_kernel(x_ref, z_ref, u_ref, *, m, max_iter):
    """Routes one tile of tile_n nodes (node axis on lanes)."""
    k, dd, tn = x_ref.shape
    x = x_ref[...].astype(jnp.float32)                        # (k, dd, tn)

    def z_slice(j):
        # neighbor j's features for this tile; static lane slice -> zero-cost view
        return z_ref[:, :, pl.ds(j * tn, tn)].astype(jnp.float32)

    # ---- iteration 0: softmax(0) over capsules == 1/k  =>  u = (1/k)*sum_j z_j + x
    acc = z_slice(0)
    for j in range(1, m):
        acc = acc + z_slice(j)
    u = acc * (1.0 / k) + x

    for _ in range(1, max_iter):                              # static -> unrolled
        # L2-normalize u over capsule width dd (sublane axis; XLU reduce -- only
        # relevant if XLU binds after the memory path fixes).
        # rsqrt(max(ss, eps^2)) == 1 / max(||u||, eps)  (torch fn.normalize semantics)
        ss = jnp.maximum(jnp.sum(u * u, axis=1, keepdims=True), 1e-24)   # (k, 1, tn)
        r = jax.lax.rsqrt(ss)
        r = r * (1.5 - 0.5 * ss * r * r)       # one Newton step on the CLAMPED ss
        un = u * r

        # routing step: agreement -> softmax over capsules -> weighted aggregation
        acc = x
        for j in range(m):
            z_j = z_slice(j)
            b = jnp.sum(z_j * un, axis=1, keepdims=True)      # (k, 1, tn) agreement
            b = b - jnp.max(b, axis=0, keepdims=True)         # stable softmax over k
            e = jnp.exp(b)
            s = jnp.sum(e, axis=0, keepdims=True)             # (1, 1, tn)
            inv = pl.reciprocal(s, approx=True)               # EUP estimate
            inv = inv * (2.0 - s * inv)                       # one Newton -> f32 accurate
            acc = acc + z_j * (e * inv)
        u = acc

    u_ref[...] = u.astype(u_ref.dtype)


def _vmem_capacity_bytes():
    """Physical per-core VMEM (v5e/v6e: 128 MiB, v7x: 64 MiB) with a safe fallback."""
    try:
        cap = getattr(pltpu.get_tpu_info(), "vmem_capacity_bytes", None)
        if cap:
            return int(cap)
    except Exception:
        pass
    return 64 * 1024 * 1024     # conservative (v7x per-TC)


def _choose_tile(n, m, d, k, in_bytes, out_bytes):
    """Generation-aware node-tile size and vmem_limit_bytes."""
    cap = _vmem_capacity_bytes()
    budget = int(cap * 0.45)
    # VMEM bytes kept live per node column: double-buffered z/x inputs, double-
    # buffered u output, plus f32 temporaries up to ~z size inside the body.
    per_node = (2 * (m + 1) * d * in_bytes            # z + x, double buffered
                + 2 * d * out_bytes                   # u, double buffered
                + 4 * ((m + 2) * d + 2 * m * k))      # f32 temporaries
    tile = 128
    for cand in (8192, 4096, 2048, 1024, 512, 256, 128):
        if cand * per_node <= budget:
            tile = cand
            break
    # bound zero-padding waste (<= ~12.5% of n), keep >=2 and preferably an even
    # number of grid steps so the "parallel" axis balances across v7x's two TCs
    while tile > 128 and (pl.cdiv(n, tile) * tile - n) * 8 > n:
        tile //= 2
    while tile > 128 and pl.cdiv(n, tile) < 2:
        tile //= 2
    steps = pl.cdiv(n, tile)
    if tile > 128 and steps > 1 and steps % 2 == 1:
        tile //= 2
    vmem_limit = int(min(0.85 * cap,
                         max(1.5 * tile * per_node + (4 << 20), 32 << 20)))
    return tile, vmem_limit


def routing_layer(x, neighbors, *, num_caps, max_iter, tile_n=None,
                  input_dtype=jnp.bfloat16):
    """Pallas implementation of RoutingLayer.forward.

    x:         (n, d) float array.
    neighbors: (n*m,) int32 in [0, n]; index n selects the zero padding row,
               exactly like the PyTorch module's torch.cat([x, zeros]) convention.
    Returns (n, d) in x.dtype.
    """
    n, d = x.shape
    k = num_caps
    assert d % k == 0 and neighbors.shape[0] % n == 0 and max_iter >= 1
    dd = d // k
    m = neighbors.shape[0] // n
    # TODO(synk): when d // num_caps < 8, fold k into the sublane axis to avoid
    # sublane padding (no effect for the default dd=8 case).

    in_bytes = jnp.dtype(input_dtype).itemsize
    out_dtype = x.dtype
    out_bytes = jnp.dtype(out_dtype).itemsize

    auto_tile, vmem_limit = _choose_tile(n, m, d, k, in_bytes, out_bytes)
    if tile_n is None:
        tile_n = auto_tile
    assert tile_n % 128 == 0 and tile_n > 0
    n_tiles = pl.cdiv(n, tile_n)
    n_pad = n_tiles * tile_n

    # --- plain-JAX glue: one normalize + ONE gather, no full-size transpose of z ---
    xc = x.astype(jnp.float32).reshape(n, k, dd)
    nrm = jnp.sqrt(jnp.sum(xc * xc, axis=2, keepdims=True))
    xn_t = jnp.transpose(xc / jnp.maximum(nrm, 1e-12), (1, 2, 0))       # (k, dd, n), small

    # self-feature input: node axis last (lane-dense), zero padded, low-precision in HBM
    x_t = jnp.pad(xn_t, ((0, 0), (0, 0), (0, n_pad - n))).astype(input_dtype)

    # gather table: normalized features + zero column at index n
    table = jnp.concatenate([xn_t, jnp.zeros((k, dd, 1), jnp.float32)],
                            axis=2).astype(input_dtype)                  # (k, dd, n+1)

    # neighbor ids reordered to (tile, neighbor, node) flat order so a single
    # last-axis gather emits z directly in the layout the kernel consumes.
    nb = neighbors.reshape(n, m).astype(jnp.int32)
    nb = jnp.pad(nb, ((0, n_pad - n), (0, 0)), constant_values=n)        # pad nodes -> zero row
    idx = jnp.transpose(nb.reshape(n_tiles, tile_n, m), (0, 2, 1)).reshape(-1)
    z_flat = jnp.take(table, idx, axis=2)                                # (k, dd, n_tiles*m*tile_n)
    # TODO(synk): replace this XLA gather with an in-kernel DMA row gather
    # (scalar-prefetched neighbor ids + memory_space=pl.ANY table) to remove the
    # remaining z write+read HBM round trip for very large graphs.

    kernel = functools.partial(routing_kernel, m=m, max_iter=max_iter)
    cost = pl.CostEstimate(
        flops=int(4 * max_iter * n_pad * m * d),
        transcendentals=int(max(max_iter - 1, 0) * n_pad * m * k),
        bytes_accessed=int((m + 1) * n_pad * d * in_bytes + n_pad * d * out_bytes),
    )

    u_t = pl.pallas_call(
        kernel,
        out_shape=jax.ShapeDtypeStruct((k, dd, n_pad), out_dtype),
        grid_spec=pltpu.PrefetchScalarGridSpec(
            num_scalar_prefetch=0,
            grid=(n_tiles,),
            in_specs=[
                pl.BlockSpec((k, dd, tile_n), lambda i: (0, 0, i)),
                pl.BlockSpec((k, dd, m * tile_n), lambda i: (0, 0, i)),
            ],
            out_specs=pl.BlockSpec((k, dd, tile_n), lambda i: (0, 0, i)),
        ),
        compiler_params=pltpu.CompilerParams(
            dimension_semantics=("parallel",),
            vmem_limit_bytes=vmem_limit,
        ),
        cost_estimate=cost,
    )(x_t, z_flat)

    # (k, dd, :n) -> (n, d); slice + transpose + reshape fuse into one small copy
    return jnp.transpose(u_t[:, :, :n], (2, 0, 1)).reshape(n, d).astype(out_dtype)


def routing_ref(x, neighbors, num_caps, max_iter):
    """Pure-JAX f32 reference mirroring the PyTorch forward exactly."""
    n, d = x.shape
    m = neighbors.shape[0] // n
    k = num_caps
    dd = d // k
    xc = x.astype(jnp.float32).reshape(n, k, dd)
    nrm = jnp.sqrt(jnp.sum(xc * xc, axis=2, keepdims=True))
    xn = (xc / jnp.maximum(nrm, 1e-12)).reshape(n, d)
    z = jnp.concatenate([xn, jnp.zeros((1, d), jnp.float32)], axis=0)
    z = z[neighbors].reshape(n, m, k, dd)
    u = None
    for clus_iter in range(max_iter):
        if u is None:
            p = jnp.zeros((n, m, k), jnp.float32)
        else:
            p = jnp.sum(z * u[:, None, :, :], axis=3)
        p = jax.nn.softmax(p, axis=2)
        u = jnp.sum(z * p[:, :, :, None], axis=1) + xn.reshape(n, k, dd)
        if clus_iter < max_iter - 1:
            nu = jnp.sqrt(jnp.sum(u * u, axis=2, keepdims=True))
            u = u / jnp.maximum(nu, 1e-12)
    return u.reshape(n, d)


if __name__ == "__main__":
    # RoutingLayer(dim=32, num_caps=4); n=8 nodes, m=4 neighbors each, 3 routing iters.
    n, d, num_caps, m, max_iter = 8, 32, 4, 4, 3

    key = jax.random.PRNGKey(0)
    kx, kn = jax.random.split(key)
    x = jax.random.normal(kx, (n, d), dtype=jnp.float32)
    # neighbor index n selects the zero pad row (same convention as the module)
    neighbors = jax.random.randint(kn, (n * m,), 0, n + 1, dtype=jnp.int32)

    ref = routing_ref(x, neighbors, num_caps, max_iter)

    # f32-input path: matches the f32 reference tightly.
    out_f32 = jax.block_until_ready(
        routing_layer(x, neighbors, num_caps=num_caps, max_iter=max_iter,
                      input_dtype=jnp.float32))
    np.testing.assert_allclose(np.asarray(out_f32), np.asarray(ref),
                               rtol=1e-5, atol=1e-5)

    # default bf16-input path (compute stays f32): tolerance reflects input
    # quantization only, per the performance review.
    out_bf16 = jax.block_until_ready(
        routing_layer(x, neighbors, num_caps=num_caps, max_iter=max_iter))
    np.testing.assert_allclose(np.asarray(out_bf16), np.asarray(ref),
                               rtol=5e-2, atol=5e-2)

    print("KERNEL_OK")
</pallas_src>

<mosaic_0001>
module attributes {stable_mosaic.version = 11 : i64} {
  func.func @routing_kernel(%arg0: i32, %arg1: memref<4x8x128xf32, #tpu.memory_space<vmem>>, %arg2: memref<4x8x512xf32, #tpu.memory_space<vmem>>, %arg3: memref<4x8x128xf32, #tpu.memory_space<vmem>>) attributes {dimension_semantics = [#tpu.dimension_semantics<parallel>], iteration_bounds = array<i64: 1>, scalar_prefetch = 0 : i64, scratch_operands = 0 : i64, tpu.core_type = #tpu.core_type<tc>, window_params = [{transform_indices = @transform_0, window_bounds = array<i64: 4, 8, 128>}, {transform_indices = @transform_1, window_bounds = array<i64: 4, 8, 512>}, {transform_indices = @transform_2, window_bounds = array<i64: 4, 8, 128>}]} {
    %c0 = arith.constant 0 : index
    %c0_0 = arith.constant 0 : index
    %c0_1 = arith.constant 0 : index
    %0 = vector.load %arg1[%c0, %c0_0, %c0_1] : memref<4x8x128xf32, #tpu.memory_space<vmem>>, vector<4x8x128xf32>
    %c0_2 = arith.constant 0 : index
    %c0_3 = arith.constant 0 : index
    %c0_4 = arith.constant 0 : index
    %1 = vector.load %arg2[%c0_2, %c0_3, %c0_4] : memref<4x8x512xf32, #tpu.memory_space<vmem>>, vector<4x8x128xf32>
    %c0_5 = arith.constant 0 : index
    %c0_6 = arith.constant 0 : index
    %c128 = arith.constant 128 : index
    %2 = vector.load %arg2[%c0_5, %c0_6, %c128] : memref<4x8x512xf32, #tpu.memory_space<vmem>>, vector<4x8x128xf32>
    %3 = arith.addf %1, %2 : vector<4x8x128xf32>
    %c0_7 = arith.constant 0 : index
    %c0_8 = arith.constant 0 : index
    %c256 = arith.constant 256 : index
    %4 = vector.load %arg2[%c0_7, %c0_8, %c256] : memref<4x8x512xf32, #tpu.memory_space<vmem>>, vector<4x8x128xf32>
    %5 = arith.addf %3, %4 : vector<4x8x128xf32>
    %c0_9 = arith.constant 0 : index
    %c0_10 = arith.constant 0 : index
    %c384 = arith.constant 384 : index
    %6 = vector.load %arg2[%c0_9, %c0_10, %c384] : memref<4x8x512xf32, #tpu.memory_space<vmem>>, vector<4x8x128xf32>
    %7 = arith.addf %5, %6 : vector<4x8x128xf32>
    %cst = arith.constant 2.500000e-01 : f32
    %8 = vector.broadcast %cst : f32 to vector<4x8x128xf32>
    %9 = arith.mulf %7, %8 : vector<4x8x128xf32>
    %10 = arith.addf %9, %0 : vector<4x8x128xf32>
    %11 = arith.mulf %10, %10 : vector<4x8x128xf32>
    %cst_11 = arith.constant dense<0.000000e+00> : vector<4x128xf32>
    %12 = vector.multi_reduction <add>, %11, %cst_11 [1] : vector<4x8x128xf32> to vector<4x128xf32>
    %13 = vector.shape_cast %12 : vector<4x128xf32> to vector<4x1x128xf32>
    %cst_12 = arith.constant 1.000000e-24 : f32
    %14 = vector.broadcast %cst_12 : f32 to vector<4x1x128xf32>
    %15 = arith.maximumf %13, %14 : vector<4x1x128xf32>
    %16 = math.rsqrt %15 : vector<4x1x128xf32>
    %cst_13 = arith.constant 5.000000e-01 : f32
    %17 = vector.broadcast %cst_13 : f32 to vector<4x1x128xf32>
    %18 = arith.mulf %17, %15 : vector<4x1x128xf32>
    %19 = arith.mulf %18, %16 : vector<4x1x128xf32>
    %20 = arith.mulf %19, %16 : vector<4x1x128xf32>
    %cst_14 = arith.constant 1.500000e+00 : f32
    %21 = vector.broadcast %cst_14 : f32 to vector<4x1x128xf32>
    %22 = arith.subf %21, %20 : vector<4x1x128xf32>
    %23 = arith.mulf %16, %22 : vector<4x1x128xf32>
    %24 = vector.broadcast %23 : vector<4x1x128xf32> to vector<4x8x128xf32>
    %25 = arith.mulf %10, %24 : vector<4x8x128xf32>
    %c0_15 = arith.constant 0 : index
    %c0_16 = arith.constant 0 : index
    %c0_17 = arith.constant 0 : index
    %26 = vector.load %arg2[%c0_15, %c0_16, %c0_17] : memref<4x8x512xf32, #tpu.memory_space<vmem>>, vector<4x8x128xf32>
    %27 = arith.mulf %26, %25 : vector<4x8x128xf32>
    %cst_18 = arith.constant dense<0.000000e+00> : vector<4x128xf32>
    %28 = vector.multi_reduction <add>, %27, %cst_18 [1] : vector<4x8x128xf32> to vector<4x128xf32>
    %29 = vector.shape_cast %28 : vector<4x128xf32> to vector<4x1x128xf32>
    %cst_19 = arith.constant dense<0xFF800000> : vector<1x128xf32>
    %30 = vector.multi_reduction <maximumf>, %29, %cst_19 [0] : vector<4x1x128xf32> to vector<1x128xf32>
    %31 = vector.shape_cast %30 : vector<1x128xf32> to vector<1x1x128xf32>
    %32 = vector.broadcast %31 : vector<1x1x128xf32> to vector<4x1x128xf32>
    %33 = arith.subf %29, %32 : vector<4x1x128xf32>
    %34 = math.exp %33 : vector<4x1x128xf32>
    %cst_20 = arith.constant dense<0.000000e+00> : vector<1x128xf32>
    %35 = vector.multi_reduction <add>, %34, %cst_20 [0] : vector<4x1x128xf32> to vector<1x128xf32>
    %36 = vector.shape_cast %35 : vector<1x128xf32> to vector<1x1x128xf32>
    %37 = tpu.reciprocal %36 {approx = true} : vector<1x1x128xf32> -> vector<1x1x128xf32>
    %38 = arith.mulf %36, %37 : vector<1x1x128xf32>
    %cst_21 = arith.constant 2.000000e+00 : f32
    %39 = vector.broadcast %cst_21 : f32 to vector<1x1x128xf32>
    %40 = arith.subf %39, %38 : vector<1x1x128xf32>
    %41 = arith.mulf %37, %40 : vector<1x1x128xf32>
    %42 = vector.broadcast %41 : vector<1x1x128xf32> to vector<4x1x128xf32>
    %43 = arith.mulf %34, %42 : vector<4x1x128xf32>
    %44 = vector.broadcast %43 : vector<4x1x128xf32> to vector<4x8x128xf32>
    %45 = arith.mulf %26, %44 : vector<4x8x128xf32>
    %46 = arith.addf %0, %45 : vector<4x8x128xf32>
    %c0_22 = arith.constant 0 : index
    %c0_23 = arith.constant 0 : index
    %c128_24 = arith.constant 128 : index
    %47 = vector.load %arg2[%c0_22, %c0_23, %c128_24] : memref<4x8x512xf32, #tpu.memory_space<vmem>>, vector<4x8x128xf32>
    %48 = arith.mulf %47, %25 : vector<4x8x128xf32>
    %cst_25 = arith.constant dense<0.000000e+00> : vector<4x128xf32>
    %49 = vector.multi_reduction <add>, %48, %cst_25 [1] : vector<4x8x128xf32> to vector<4x128xf32>
    %50 = vector.shape_cast %49 : vector<4x128xf32> to vector<4x1x128xf32>
    %cst_26 = arith.constant dense<0xFF800000> : vector<1x128xf32>
    %51 = vector.multi_reduction <maximumf>, %50, %cst_26 [0] : vector<4x1x128xf32> to vector<1x128xf32>
    %52 = vector.shape_cast %51 : vector<1x128xf32> to vector<1x1x128xf32>
    %53 = vector.broadcast %52 : vector<1x1x128xf32> to vector<4x1x128xf32>
    %54 = arith.subf %50, %53 : vector<4x1x128xf32>
    %55 = math.exp %54 : vector<4x1x128xf32>
    %cst_27 = arith.constant dense<0.000000e+00> : vector<1x128xf32>
    %56 = vector.multi_reduction <add>, %55, %cst_27 [0] : vector<4x1x128xf32> to vector<1x128xf32>
    %57 = vector.shape_cast %56 : vector<1x128xf32> to vector<1x1x128xf32>
    %58 = tpu.reciprocal %57 {approx = true} : vector<1x1x128xf32> -> vector<1x1x128xf32>
    %59 = arith.mulf %57, %58 : vector<1x1x128xf32>
    %cst_28 = arith.constant 2.000000e+00 : f32
    %60 = vector.broadcast %cst_28 : f32 to vector<1x1x128xf32>
    %61 = arith.subf %60, %59 : vector<1x1x128xf32>
    %62 = arith.mulf %58, %61 : vector<1x1x128xf32>
    %63 = vector.broadcast %62 : vector<1x1x128xf32> to vector<4x1x128xf32>
    %64 = arith.mulf %55, %63 : vector<4x1x128xf32>
    %65 = vector.broadcast %64 : vector<4x1x128xf32> to vector<4x8x128xf32>
    %66 = arith.mulf %47, %65 : vector<4x8x128xf32>
    %67 = arith.addf %46, %66 : vector<4x8x128xf32>
    %c0_29 = arith.constant 0 : index
    %c0_30 = arith.constant 0 : index
    %c256_31 = arith.constant 256 : index
    %68 = vector.load %arg2[%c0_29, %c0_30, %c256_31] : memref<4x8x512xf32, #tpu.memory_space<vmem>>, vector<4x8x128xf32>
    %69 = arith.mulf %68, %25 : vector<4x8x128xf32>
    %cst_32 = arith.constant dense<0.000000e+00> : vector<4x128xf32>
    %70 = vector.multi_reduction <add>, %69, %cst_32 [1] : vector<4x8x128xf32> to vector<4x128xf32>
    %71 = vector.shape_cast %70 : vector<4x128xf32> to vector<4x1x128xf32>
    %cst_33 = arith.constant dense<0xFF800000> : vector<1x128xf32>
    %72 = vector.multi_reduction <maximumf>, %71, %cst_33 [0] : vector<4x1x128xf32> to vector<1x128xf32>
    %73 = vector.shape_cast %72 : vector<1x128xf32> to vector<1x1x128xf32>
    %74 = vector.broadcast %73 : vector<1x1x128xf32> to vector<4x1x128xf32>
    %75 = arith.subf %71, %74 : vector<4x1x128xf32>
    %76 = math.exp %75 : vector<4x1x128xf32>
    %cst_34 = arith.constant dense<0.000000e+00> : vector<1x128xf32>
    %77 = vector.multi_reduction <add>, %76, %cst_34 [0] : vector<4x1x128xf32> to vector<1x128xf32>
    %78 = vector.shape_cast %77 : vector<1x128xf32> to vector<1x1x128xf32>
    %79 = tpu.reciprocal %78 {approx = true} : vector<1x1x128xf32> -> vector<1x1x128xf32>
    %80 = arith.mulf %78, %79 : vector<1x1x128xf32>
    %cst_35 = arith.constant 2.000000e+00 : f32
    %81 = vector.broadcast %cst_35 : f32 to vector<1x1x128xf32>
    %82 = arith.subf %81, %80 : vector<1x1x128xf32>
    %83 = arith.mulf %79, %82 : vector<1x1x128xf32>
    %84 = vector.broadcast %83 : vector<1x1x128xf32> to vector<4x1x128xf32>
    %85 = arith.mulf %76, %84 : vector<4x1x128xf32>
    %86 = vector.broadcast %85 : vector<4x1x128xf32> to vector<4x8x128xf32>
    %87 = arith.mulf %68, %86 : vector<4x8x128xf32>
    %88 = arith.addf %67, %87 : vector<4x8x128xf32>
    %c0_36 = arith.constant 0 : index
    %c0_37 = arith.constant 0 : index
    %c384_38 = arith.constant 384 : index
    %89 = vector.load %arg2[%c0_36, %c0_37, %c384_38] : memref<4x8x512xf32, #tpu.memory_space<vmem>>, vector<4x8x128xf32>
    %90 = arith.mulf %89, %25 : vector<4x8x128xf32>
    %cst_39 = arith.constant dense<0.000000e+00> : vector<4x128xf32>
    %91 = vector.multi_reduction <add>, %90, %cst_39 [1] : vector<4x8x128xf32> to vector<4x128xf32>
    %92 = vector.shape_cast %91 : vector<4x128xf32> to vector<4x1x128xf32>
    %cst_40 = arith.constant dense<0xFF800000> : vector<1x128xf32>
    %93 = vector.multi_reduction <maximumf>, %92, %cst_40 [0] : vector<4x1x128xf32> to vector<1x128xf32>
    %94 = vector.shape_cast %93 : vector<1x128xf32> to vector<1x1x128xf32>
    %95 = vector.broadcast %94 : vector<1x1x128xf32> to vector<4x1x128xf32>
    %96 = arith.subf %92, %95 : vector<4x1x128xf32>
    %97 = math.exp %96 : vector<4x1x128xf32>
    %cst_41 = arith.constant dense<0.000000e+00> : vector<1x128xf32>
    %98 = vector.multi_reduction <add>, %97, %cst_41 [0] : vector<4x1x128xf32> to vector<1x128xf32>
    %99 = vector.shape_cast %98 : vector<1x128xf32> to vector<1x1x128xf32>
    %100 = tpu.reciprocal %99 {approx = true} : vector<1x1x128xf32> -> vector<1x1x128xf32>
    %101 = arith.mulf %99, %100 : vector<1x1x128xf32>
    %cst_42 = arith.constant 2.000000e+00 : f32
    %102 = vector.broadcast %cst_42 : f32 to vector<1x1x128xf32>
    %103 = arith.subf %102, %101 : vector<1x1x128xf32>
    %104 = arith.mulf %100, %103 : vector<1x1x128xf32>
    %105 = vector.broadcast %104 : vector<1x1x128xf32> to vector<4x1x128xf32>
    %106 = arith.mulf %97, %105 : vector<4x1x128xf32>
    %107 = vector.broadcast %106 : vector<4x1x128xf32> to vector<4x8x128xf32>
    %108 = arith.mulf %89, %107 : vector<4x8x128xf32>
    %109 = arith.addf %88, %108 : vector<4x8x128xf32>
    %110 = arith.mulf %109, %109 : vector<4x8x128xf32>
    %cst_43 = arith.constant dense<0.000000e+00> : vector<4x128xf32>
    %111 = vector.multi_reduction <add>, %110, %cst_43 [1] : vector<4x8x128xf32> to vector<4x128xf32>
    %112 = vector.shape_cast %111 : vector<4x128xf32> to vector<4x1x128xf32>
    %cst_44 = arith.constant 1.000000e-24 : f32
    %113 = vector.broadcast %cst_44 : f32 to vector<4x1x128xf32>
    %114 = arith.maximumf %112, %113 : vector<4x1x128xf32>
    %115 = math.rsqrt %114 : vector<4x1x128xf32>
    %cst_45 = arith.constant 5.000000e-01 : f32
    %116 = vector.broadcast %cst_45 : f32 to vector<4x1x128xf32>
    %117 = arith.mulf %116, %114 : vector<4x1x128xf32>
    %118 = arith.mulf %117, %115 : vector<4x1x128xf32>
    %119 = arith.mulf %118, %115 : vector<4x1x128xf32>
    %cst_46 = arith.constant 1.500000e+00 : f32
    %120 = vector.broadcast %cst_46 : f32 to vector<4x1x128xf32>
    %121 = arith.subf %120, %119 : vector<4x1x128xf32>
    %122 = arith.mulf %115, %121 : vector<4x1x128xf32>
    %123 = vector.broadcast %122 : vector<4x1x128xf32> to vector<4x8x128xf32>
    %124 = arith.mulf %109, %123 : vector<4x8x128xf32>
    %c0_47 = arith.constant 0 : index
    %c0_48 = arith.constant 0 : index
    %c0_49 = arith.constant 0 : index
    %125 = vector.load %arg2[%c0_47, %c0_48, %c0_49] : memref<4x8x512xf32, #tpu.memory_space<vmem>>, vector<4x8x128xf32>
    %126 = arith.mulf %125, %124 : vector<4x8x128xf32>
    %cst_50 = arith.constant dense<0.000000e+00> : vector<4x128xf32>
    %127 = vector.multi_reduction <add>, %126, %cst_50 [1] : vector<4x8x128xf32> to vector<4x128xf32>
    %128 = vector.shape_cast %127 : vector<4x128xf32> to vector<4x1x128xf32>
    %cst_51 = arith.constant dense<0xFF800000> : vector<1x128xf32>
    %129 = vector.multi_reduction <maximumf>, %128, %cst_51 [0] : vector<4x1x128xf32> to vector<1x128xf32>
    %130 = vector.shape_cast %129 : vector<1x128xf32> to vector<1x1x128xf32>
    %131 = vector.broadcast %130 : vector<1x1x128xf32> to vector<4x1x128xf32>
    %132 = arith.subf %128, %131 : vector<4x1x128xf32>
    %133 = math.exp %132 : vector<4x1x128xf32>
    %cst_52 = arith.constant dense<0.000000e+00> : vector<1x128xf32>
    %134 = vector.multi_reduction <add>, %133, %cst_52 [0] : vector<4x1x128xf32> to vector<1x128xf32>
    %135 = vector.shape_cast %134 : vector<1x128xf32> to vector<1x1x128xf32>
    %136 = tpu.reciprocal %135 {approx = true} : vector<1x1x128xf32> -> vector<1x1x128xf32>
    %137 = arith.mulf %135, %136 : vector<1x1x128xf32>
    %cst_53 = arith.constant 2.000000e+00 : f32
    %138 = vector.broadcast %cst_53 : f32 to vector<1x1x128xf32>
    %139 = arith.subf %138, %137 : vector<1x1x128xf32>
    %140 = arith.mulf %136, %139 : vector<1x1x128xf32>
    %141 = vector.broadcast %140 : vector<1x1x128xf32> to vector<4x1x128xf32>
    %142 = arith.mulf %133, %141 : vector<4x1x128xf32>
    %143 = vector.broadcast %142 : vector<4x1x128xf32> to vector<4x8x128xf32>
    %144 = arith.mulf %125, %143 : vector<4x8x128xf32>
    %145 = arith.addf %0, %144 : vector<4x8x128xf32>
    %c0_54 = arith.constant 0 : index
    %c0_55 = arith.constant 0 : index
    %c128_56 = arith.constant 128 : index
    %146 = vector.load %arg2[%c0_54, %c0_55, %c128_56] : memref<4x8x512xf32, #tpu.memory_space<vmem>>, vector<4x8x128xf32>
    %147 = arith.mulf %146, %124 : vector<4x8x128xf32>
    %cst_57 = arith.constant dense<0.000000e+00> : vector<4x128xf32>
    %148 = vector.multi_reduction <add>, %147, %cst_57 [1] : vector<4x8x128xf32> to vector<4x128xf32>
    %149 = vector.shape_cast %148 : vector<4x128xf32> to vector<4x1x128xf32>
    %cst_58 = arith.constant dense<0xFF800000> : vector<1x128xf32>
    %150 = vector.multi_reduction <maximumf>, %149, %cst_58 [0] : vector<4x1x128xf32> to vector<1x128xf32>
    %151 = vector.shape_cast %150 : vector<1x128xf32> to vector<1x1x128xf32>
    %152 = vector.broadcast %151 : vector<1x1x128xf32> to vector<4x1x128xf32>
    %153 = arith.subf %149, %152 : vector<4x1x128xf32>
    %154 = math.exp %153 : vector<4x1x128xf32>
    %cst_59 = arith.constant dense<0.000000e+00> : vector<1x128xf32>
    %155 = vector.multi_reduction <add>, %154, %cst_59 [0] : vector<4x1x128xf32> to vector<1x128xf32>
    %156 = vector.shape_cast %155 : vector<1x128xf32> to vector<1x1x128xf32>
    %157 = tpu.reciprocal %156 {approx = true} : vector<1x1x128xf32> -> vector<1x1x128xf32>
    %158 = arith.mulf %156, %157 : vector<1x1x128xf32>
    %cst_60 = arith.constant 2.000000e+00 : f32
    %159 = vector.broadcast %cst_60 : f32 to vector<1x1x128xf32>
    %160 = arith.subf %159, %158 : vector<1x1x128xf32>
    %161 = arith.mulf %157, %160 : vector<1x1x128xf32>
    %162 = vector.broadcast %161 : vector<1x1x128xf32> to vector<4x1x128xf32>
    %163 = arith.mulf %154, %162 : vector<4x1x128xf32>
    %164 = vector.broadcast %163 : vector<4x1x128xf32> to vector<4x8x128xf32>
    %165 = arith.mulf %146, %164 : vector<4x8x128xf32>
    %166 = arith.addf %145, %165 : vector<4x8x128xf32>
    %c0_61 = arith.constant 0 : index
    %c0_62 = arith.constant 0 : index
    %c256_63 = arith.constant 256 : index
    %167 = vector.load %arg2[%c0_61, %c0_62, %c256_63] : memref<4x8x512xf32, #tpu.memory_space<vmem>>, vector<4x8x128xf32>
    %168 = arith.mulf %167, %124 : vector<4x8x128xf32>
    %cst_64 = arith.constant dense<0.000000e+00> : vector<4x128xf32>
    %169 = vector.multi_reduction <add>, %168, %cst_64 [1] : vector<4x8x128xf32> to vector<4x128xf32>
    %170 = vector.shape_cast %169 : vector<4x128xf32> to vector<4x1x128xf32>
    %cst_65 = arith.constant dense<0xFF800000> : vector<1x128xf32>
    %171 = vector.multi_reduction <maximumf>, %170, %cst_65 [0] : vector<4x1x128xf32> to vector<1x128xf32>
    %172 = vector.shape_cast %171 : vector<1x128xf32> to vector<1x1x128xf32>
    %173 = vector.broadcast %172 : vector<1x1x128xf32> to vector<4x1x128xf32>
    %174 = arith.subf %170, %173 : vector<4x1x128xf32>
    %175 = math.exp %174 : vector<4x1x128xf32>
    %cst_66 = arith.constant dense<0.000000e+00> : vector<1x128xf32>
    %176 = vector.multi_reduction <add>, %175, %cst_66 [0] : vector<4x1x128xf32> to vector<1x128xf32>
    %177 = vector.shape_cast %176 : vector<1x128xf32> to vector<1x1x128xf32>
    %178 = tpu.reciprocal %177 {approx = true} : vector<1x1x128xf32> -> vector<1x1x128xf32>
    %179 = arith.mulf %177, %178 : vector<1x1x128xf32>
    %cst_67 = arith.constant 2.000000e+00 : f32
    %180 = vector.broadcast %cst_67 : f32 to vector<1x1x128xf32>
    %181 = arith.subf %180, %179 : vector<1x1x128xf32>
    %182 = arith.mulf %178, %181 : vector<1x1x128xf32>
    %183 = vector.broadcast %182 : vector<1x1x128xf32> to vector<4x1x128xf32>
    %184 = arith.mulf %175, %183 : vector<4x1x128xf32>
    %185 = vector.broadcast %184 : vector<4x1x128xf32> to vector<4x8x128xf32>
    %186 = arith.mulf %167, %185 : vector<4x8x128xf32>
    %187 = arith.addf %166, %186 : vector<4x8x128xf32>
    %c0_68 = arith.constant 0 : index
    %c0_69 = arith.constant 0 : index
    %c384_70 = arith.constant 384 : index
    %188 = vector.load %arg2[%c0_68, %c0_69, %c384_70] : memref<4x8x512xf32, #tpu.memory_space<vmem>>, vector<4x8x128xf32>
    %189 = arith.mulf %188, %124 : vector<4x8x128xf32>
    %cst_71 = arith.constant dense<0.000000e+00> : vector<4x128xf32>
    %190 = vector.multi_reduction <add>, %189, %cst_71 [1] : vector<4x8x128xf32> to vector<4x128xf32>
    %191 = vector.shape_cast %190 : vector<4x128xf32> to vector<4x1x128xf32>
    %cst_72 = arith.constant dense<0xFF800000> : vector<1x128xf32>
    %192 = vector.multi_reduction <maximumf>, %191, %cst_72 [0] : vector<4x1x128xf32> to vector<1x128xf32>
    %193 = vector.shape_cast %192 : vector<1x128xf32> to vector<1x1x128xf32>
    %194 = vector.broadcast %193 : vector<1x1x128xf32> to vector<4x1x128xf32>
    %195 = arith.subf %191, %194 : vector<4x1x128xf32>
    %196 = math.exp %195 : vector<4x1x128xf32>
    %cst_73 = arith.constant dense<0.000000e+00> : vector<1x128xf32>
    %197 = vector.multi_reduction <add>, %196, %cst_73 [0] : vector<4x1x128xf32> to vector<1x128xf32>
    %198 = vector.shape_cast %197 : vector<1x128xf32> to vector<1x1x128xf32>
    %199 = tpu.reciprocal %198 {approx = true} : vector<1x1x128xf32> -> vector<1x1x128xf32>
    %200 = arith.mulf %198, %199 : vector<1x1x128xf32>
    %cst_74 = arith.constant 2.000000e+00 : f32
    %201 = vector.broadcast %cst_74 : f32 to vector<1x1x128xf32>
    %202 = arith.subf %201, %200 : vector<1x1x128xf32>
    %203 = arith.mulf %199, %202 : vector<1x1x128xf32>
    %204 = vector.broadcast %203 : vector<1x1x128xf32> to vector<4x1x128xf32>
    %205 = arith.mulf %196, %204 : vector<4x1x128xf32>
    %206 = vector.broadcast %205 : vector<4x1x128xf32> to vector<4x8x128xf32>
    %207 = arith.mulf %188, %206 : vector<4x8x128xf32>
    %208 = arith.addf %187, %207 : vector<4x8x128xf32>
    %c0_75 = arith.constant 0 : index
    %c0_76 = arith.constant 0 : index
    %c0_77 = arith.constant 0 : index
    %209 = vector.load %arg3[%c0_75, %c0_76, %c0_77] : memref<4x8x128xf32, #tpu.memory_space<vmem>>, vector<4x8x128xf32>
    tpu.vector_store %arg3[%c0_75, %c0_76, %c0_77], %208 {strides = array<i32>} : memref<4x8x128xf32, #tpu.memory_space<vmem>>, vector<4x8x128xf32>,
    return
  }
  func.func @transform_0(%arg0: i32) -> (i32, i32, i32) {
    %c0_i32 = arith.constant 0 : i32
    %c0_i32_0 = arith.constant 0 : i32
    %c0_i32_1 = arith.constant 0 : i32
    return %c0_i32, %c0_i32_0, %arg0 : i32, i32, i32
  }
  func.func @transform_1(%arg0: i32) -> (i32, i32, i32) {
    %c0_i32 = arith.constant 0 : i32
    %c0_i32_0 = arith.constant 0 : i32
    %c0_i32_1 = arith.constant 0 : i32
    return %c0_i32, %c0_i32_0, %arg0 : i32, i32, i32
  }
  func.func @transform_2(%arg0: i32) -> (i32, i32, i32) {
    %c0_i32 = arith.constant 0 : i32
    %c0_i32_0 = arith.constant 0 : i32
    %c0_i32_1 = arith.constant 0 : i32
    return %c0_i32, %c0_i32_0, %arg0 : i32, i32, i32
  }
}

</mosaic_0001>

<bundles_post_ra>
// kernel: tpu_custom_call.1
= control target key start
LH: loop header
LB: loop body
LE: loop exit
PB: predicated region body
PF: predicated region fallthrough
CT: control target
= control target key end

     0   :  { %7 = vsyncpa [#allocation3], 0  ;;  %s1285_s0 = inlined_call_operand.hbm [shape: f32[4,8,128], index: 0, kind: input, shape index: {}]   ;;  %s1286_s1 = inlined_call_operand.hbm [shape: f32[4,8,512], index: 1, kind: input, shape index: {}]   ;;  %s1287_s2 = inlined_call_operand.hbm [shape: f32[4,8,128], index: 2, kind: output, shape index: {}]  }
   0x1   :  { %8 = vsyncpa [#allocation6], 0 }
   0x2   :  { %9 = vsyncpa [#allocation4], 0  ;;  %s913_s9 = smov [#allocation2]   ;;  %s841_s13 = scalar_lea.hbm %s1285_s0, 512 }
   0x3   :  { %s15_s10 = sshll.u32 %s913_s9, 4  ;;  %p842_p0 = scmp.ne.s32.totalorder %s1285_s0, %s841_s13  ;;  %s16_s10 = int_to_ptr.vmem [resolvable:$true] %s15_s10 }
   0x4   :  { %p845_p1 = scmp.lt.u32.totalorder %s841_s13, %s1285_s0 }
   0x6   :  { %p847_p2 = pnand %p845_p1, %p842_p0 }
   0x8   :  { %850 = shalt.err (!%p847_p2)
}
   0x9   :  { %s851_s18 = scalar_lea.vmem %s16_s10, 512  ;;  %p856_p4 = scmp.lt.s32.totalorder %s16_s10, %s16_s10 }
   0xa   :  { %p852_p3 = scmp.ne.s32.totalorder %s16_s10, %s851_s18  ;;  %p857_p5 = scmp.lt.s32.totalorder %s851_s18, %s851_s18 }
   0xc   :  { %p858_p6 = por %p857_p5, %p856_p4 }
   0xe   :  { %p859_p7 = pnand %p858_p6, %p852_p3 }
  0x10   :  { %862 = shalt.err (!%p859_p7)
}
  0x11   :  { %s914_s19 = smov 128   ;;  %s915_s20 = smov 8  }
  0x12   :  { %21 = dma.hbm_to_vmem [thread:$0]  %s1285_s0, 512, %s16_s10, [#allocation3], %s914_s19, %s914_s19, %s915_s20  }
  0x13   :  { %s916_s23 = smov [#allocation5]   ;;  %s863_s27 = scalar_lea.hbm %s1286_s1, 2048 }
  0x14   :  { %s27_s24 = sshll.u32 %s916_s23, 4  ;;  %p864_p8 = scmp.ne.s32.totalorder %s1286_s1, %s863_s27  ;;  %s28_s24 = int_to_ptr.vmem [resolvable:$true] %s27_s24 }
  0x15   :  { %p867_p9 = scmp.lt.u32.totalorder %s863_s27, %s1286_s1 }
  0x17   :  { %p869_p10 = pnand %p867_p9, %p864_p8 }
  0x19   :  { %872 = shalt.err (!%p869_p10)
}
  0x1a   :  { %s873_s4 = scalar_lea.vmem %s28_s24, 2048  ;;  %p878_p12 = scmp.lt.s32.totalorder %s28_s24, %s28_s24 }
  0x1b   :  { %p874_p11 = scmp.ne.s32.totalorder %s28_s24, %s873_s4  ;;  %p879_p13 = scmp.lt.s32.totalorder %s873_s4, %s873_s4 }
  0x1d   :  { %p880_p0 = por %p879_p13, %p878_p12 }
  0x1f   :  { %p881_p1 = pnand %p880_p0, %p874_p11 }
  0x21   :  { %884 = shalt.err (!%p881_p1)
}
  0x22   :  { %s917_s0 = smov 512   ;;  %s918_s5 = smov 32  }
  0x23   :  { %33 = dma.hbm_to_vmem [thread:$0]  %s1286_s1, 2048, %s28_s24, [#allocation6], %s917_s0, %s917_s0, %s918_s5  }
  0x24   :  { %907 = dma.done.wait [#allocation3], 512  }
  0x25   :  { %908 = vsyncadd [#allocation3], 4294966784 }
  0x26   :  { %909 = dma.done.wait [#allocation6], 2048  }
  0x27   :  { %910 = vsyncadd [#allocation6], 4294965248  ;;  %v962_v0 = vld [vmem:[#allocation5] sm:$0xff]  ;;  %v970_v4 = vld [vmem:[#allocation5 + $0x8] sm:$0xff]  ;;  %s919_s1 = smov [#allocation7]  }
  0x28   :  { %v964_v1 = vld [vmem:[#allocation5 + $0x20] sm:$0xff]  ;;  %v972_v5 = vld [vmem:[#allocation5 + $0x28] sm:$0xff]  ;;  %v52_v8 = vadd.f32 %v970_v4, %v962_v0  ;;  %v986_v12 = vld [vmem:[#allocation5 + $0x10] sm:$0xff]  ;;  %s705_s8 = sshll.u32 %s919_s1, 4  ;;  %s706_s8 = int_to_ptr.vmem [resolvable:$true] %s705_s8 }
  0x29   :  { %v966_v2 = vld [vmem:[#allocation5 + $0x40] sm:$0xff]  ;;  %v974_v6 = vld [vmem:[#allocation5 + $0x48] sm:$0xff]  ;;  %v53_v9 = vadd.f32 %v972_v5, %v964_v1  ;;  %v988_v13 = vld [vmem:[#allocation5 + $0x30] sm:$0xff]  ;;  %s885_s9 = scalar_lea.vmem %s706_s8, 512  ;;  %p890_p3 = scmp.lt.s32.totalorder %s706_s8, %s706_s8 }
  0x2a   :  { %v968_v3 = vld [vmem:[#allocation5 + $0x60] sm:$0xff]  ;;  %v976_v7 = vld [vmem:[#allocation5 + $0x68] sm:$0xff]  ;;  %v54_v10 = vadd.f32 %v974_v6, %v966_v2  ;;  %v990_v14 = vld [vmem:[#allocation5 + $0x50] sm:$0xff]  ;;  %v60_v16 = vadd.f32 %v986_v12, %v52_v8  ;;  %p886_p2 = scmp.ne.s32.totalorder %s706_s8, %s885_s9  ;;  %p891_p4 = scmp.lt.s32.totalorder %s885_s9, %s885_s9 }
  0x2b   :  { %v55_v11 = vadd.f32 %v976_v7, %v968_v3  ;;  %v992_v15 = vld [vmem:[#allocation5 + $0x70] sm:$0xff]  ;;  %v995_v17 = vld [vmem:[#allocation5 + $0x18] sm:$0xff]  ;;  %v61_v19 = vadd.f32 %v988_v13, %v53_v9  ;;  %v1007_v25 = vld [vmem:[#allocation2] sm:$0xff] }
  0x2c   :  { %v997_v18 = vld [vmem:[#allocation5 + $0x38] sm:$0xff]  ;;  %v62_v20 = vadd.f32 %v990_v14, %v54_v10  ;;  %v68_v24 = vadd.f32 %v995_v17, %v60_v16  ;;  %v1012_v29 = vld [vmem:[#allocation2 + $0x8] sm:$0xff]  ;;  %v1014_v30 = vld [vmem:[#allocation2 + $0x10] sm:$0xff]  ;;  %p892_p5 = por %p891_p4, %p890_p3 }
  0x2d   :  { %v63_v21 = vadd.f32 %v992_v15, %v55_v11  ;;  %v1002_v22 = vld [vmem:[#allocation5 + $0x58] sm:$0xff]  ;;  %v69_v26 = vadd.f32 %v997_v18, %v61_v19 }
  0x2e   :  { %v1004_v23 = vld [vmem:[#allocation5 + $0x78] sm:$0xff]  ;;  %v70_v27 = vadd.f32 %v1002_v22, %v62_v20  ;;  %v72_v32 = vmul.f32 0.25, %v68_v24  ;;  %p893_p6 = pnand %p892_p5, %p886_p2 }
  0x2f   :  { %v71_v28 = vadd.f32 %v1004_v23, %v63_v21  ;;  %v1016_v31 = vld [vmem:[#allocation2 + $0x18] sm:$0xff]  ;;  %v73_v33 = vmul.f32 0.25, %v69_v26 }
  0x30   :  { %v74_v34 = vmul.f32 0.25, %v70_v27  ;;  %v1019_v36 = vadd.f32 %v72_v32, %v1007_v25 }
  0x31   :  { %v75_v35 = vmul.f32 0.25, %v71_v28  ;;  %v1022_v37 = vadd.f32 %v73_v33, %v1012_v29 }
  0x32   :  { %v1025_v38 = vadd.f32 %v74_v34, %v1014_v30  ;;  %v80_v40 = vmul.f32 %v1019_v36, %v1019_v36 }
  0x33   :  { %v1028_v39 = vadd.f32 %v75_v35, %v1016_v31  ;;  %v81_v41 = vmul.f32 %v1022_v37, %v1022_v37 }
  0x34   :  { %v82_v42 = vmul.f32 %v1025_v38, %v1025_v38  ;;  %v84_v44 = vrot.slane %v80_v40, 4 }
  0x35   :  { %v83_v43 = vmul.f32 %v1028_v39, %v1028_v39  ;;  %v90_v45 = vrot.slane %v81_v41, 4 }
  0x36   :  { %v96_v46 = vrot.slane %v82_v42, 4  ;;  %v85_v48 = vadd.f32 %v84_v44, %v80_v40 }
  0x37   :  { %v102_v47 = vrot.slane %v83_v43, 4  ;;  %v91_v49 = vadd.f32 %v90_v45, %v81_v41 }
  0x38   :  { %v97_v50 = vadd.f32 %v96_v46, %v82_v42  ;;  %v86_v52 = vrot.slane %v85_v48, 2 }
  0x39   :  { %v103_v51 = vadd.f32 %v102_v47, %v83_v43  ;;  %v92_v53 = vrot.slane %v91_v49, 2 }
  0x3a   :  { %v98_v54 = vrot.slane %v97_v50, 2  ;;  %v87_v56 = vadd.f32 %v86_v52, %v85_v48 }
  0x3b   :  { %v104_v55 = vrot.slane %v103_v51, 2  ;;  %v93_v57 = vadd.f32 %v92_v53, %v91_v49 }
  0x3c   :  { %v99_v58 = vadd.f32 %v98_v54, %v97_v50  ;;  %v88_v60 = vrot.slane %v87_v56, 1 }
  0x3d   :  { %v105_v59 = vadd.f32 %v104_v55, %v103_v51  ;;  %v94_v61 = vrot.slane %v93_v57, 1 }
  0x3e   :  { %v100_v62 = vrot.slane %v99_v58, 1  ;;  %v89_v8 = vadd.f32 %v88_v60, %v87_v56 }
  0x3f   :  { %v106_v63 = vrot.slane %v105_v59, 1  ;;  %v95_v9 = vadd.f32 %v94_v61, %v93_v57 }
  0x40   :  { %v101_v10 = vadd.f32 %v100_v62, %v99_v58  ;;  %v108_v16 = vmax.f32 %v89_v8, 1e-24 }
  0x41   :  { %v107_v11 = vadd.f32 %v106_v63, %v105_v59  ;;  %v109_v19 = vmax.f32 %v95_v9, 1e-24 }
  0x42   :  { %v110_v20 = vmax.f32 %v101_v10, 1e-24  ;;  %725 = vrsqrt.f32 %v108_v16  ;;  %v116_v24 = vmul.f32 0.5, %v108_v16 }
  0x43   :  { %v111_v21 = vmax.f32 %v107_v11, 1e-24  ;;  %727 = vrsqrt.f32 %v109_v19  ;;  %v117_v26 = vmul.f32 0.5, %v109_v19 }
  0x44   :  { %729 = vrsqrt.f32 %v110_v20  ;;  %v118_v27 = vmul.f32 0.5, %v110_v20 }
  0x45   :  { %731 = vrsqrt.f32 %v111_v21  ;;  %v119_v32 = vmul.f32 0.5, %v111_v21 }
  0x4c   :  { %v726_v28 = vpop.eup %725 }
  0x4d   :  { %v728_v33 = vpop.eup %727  ;;  %v120_v34 = vmul.f32 %v726_v28, %v116_v24 }
  0x4e   :  { %v730_v35 = vpop.eup %729  ;;  %v121_v40 = vmul.f32 %v728_v33, %v117_v26 }
  0x4f   :  { %v732_v41 = vpop.eup %731  ;;  %v122_v42 = vmul.f32 %v730_v35, %v118_v27  ;;  %v124_v43 = vmul.f32 %v726_v28, %v120_v34 }
  0x50   :  { %v123_v44 = vmul.f32 %v732_v41, %v119_v32  ;;  %v125_v45 = vmul.f32 %v728_v33, %v121_v40 }
  0x51   :  { %v126_v46 = vmul.f32 %v730_v35, %v122_v42  ;;  %v128_v47 = vsub.f32 1.5, %v124_v43 }
  0x52   :  { %v127_v48 = vmul.f32 %v732_v41, %v123_v44  ;;  %v129_v49 = vsub.f32 1.5, %v125_v45 }
  0x53   :  { %v130_v50 = vsub.f32 1.5, %v126_v46  ;;  %v132_v51 = vmul.f32 %v726_v28, %v128_v47 }
  0x54   :  { %v131_v52 = vsub.f32 1.5, %v127_v48  ;;  %v133_v53 = vmul.f32 %v728_v33, %v129_v49 }
  0x55   :  { %v134_v54 = vmul.f32 %v730_v35, %v130_v50  ;;  %v1039_v55 = vmul.f32 %v132_v51, %v1019_v36 }
  0x56   :  { %v135_v56 = vmul.f32 %v732_v41, %v131_v52  ;;  %v1042_v57 = vmul.f32 %v133_v53, %v1022_v37 }
  0x57   :  { %v1045_v58 = vmul.f32 %v134_v54, %v1025_v38  ;;  %v140_v59 = vmul.f32 %v1039_v55, %v962_v0  ;;  %v202_v60 = vmul.f32 %v1039_v55, %v970_v4  ;;  %v1053_v61 = vmul.f32 %v1039_v55, %v986_v12 }
  0x58   :  { %v1056_v36 = vmul.f32 %v135_v56, %v1028_v39  ;;  %v141_v37 = vmul.f32 %v1042_v57, %v964_v1  ;;  %v203_v38 = vmul.f32 %v1042_v57, %v972_v5  ;;  %v1064_v62 = vmul.f32 %v1042_v57, %v988_v13 }
  0x59   :  { %v142_v63 = vmul.f32 %v1045_v58, %v966_v2  ;;  %v144_v8 = vrot.slane %v140_v59, 4  ;;  %v204_v9 = vmul.f32 %v1045_v58, %v974_v6  ;;  %v206_v10 = vrot.slane %v202_v60, 4 }
  0x5a   :  { %v143_v39 = vmul.f32 %v1056_v36, %v968_v3  ;;  %v150_v11 = vrot.slane %v141_v37, 4  ;;  %v205_v16 = vmul.f32 %v1056_v36, %v976_v7  ;;  %v212_v19 = vrot.slane %v203_v38, 4 }
  0x5b   :  { %v145_v20 = vadd.f32 %v144_v8, %v140_v59  ;;  %v156_v21 = vrot.slane %v142_v63, 4  ;;  %v207_v24 = vadd.f32 %v206_v10, %v202_v60  ;;  %v218_v26 = vrot.slane %v204_v9, 4 }
  0x5c   :  { %v151_v27 = vadd.f32 %v150_v11, %v141_v37  ;;  %v162_v28 = vrot.slane %v143_v39, 4  ;;  %v213_v32 = vadd.f32 %v212_v19, %v203_v38  ;;  %v224_v33 = vrot.slane %v205_v16, 4 }
  0x5d   :  { %v146_v34 = vrot.slane %v145_v20, 2  ;;  %v157_v35 = vadd.f32 %v156_v21, %v142_v63  ;;  %v208_v40 = vrot.slane %v207_v24, 2  ;;  %v219_v41 = vadd.f32 %v218_v26, %v204_v9 }
  0x5e   :  { %v152_v42 = vrot.slane %v151_v27, 2  ;;  %v163_v43 = vadd.f32 %v162_v28, %v143_v39  ;;  %v214_v44 = vrot.slane %v213_v32, 2  ;;  %v225_v45 = vadd.f32 %v224_v33, %v205_v16 }
  0x5f   :  { %v147_v46 = vadd.f32 %v146_v34, %v145_v20  ;;  %v158_v47 = vrot.slane %v157_v35, 2  ;;  %v209_v48 = vadd.f32 %v208_v40, %v207_v24  ;;  %v220_v49 = vrot.slane %v219_v41, 2 }
  0x60   :  { %v153_v50 = vadd.f32 %v152_v42, %v151_v27  ;;  %v164_v51 = vrot.slane %v163_v43, 2  ;;  %v215_v52 = vadd.f32 %v214_v44, %v213_v32  ;;  %v226_v53 = vrot.slane %v225_v45, 2 }
  0x61   :  { %v148_v54 = vrot.slane %v147_v46, 1  ;;  %v159_v56 = vadd.f32 %v158_v47, %v157_v35  ;;  %v210_v59 = vrot.slane %v209_v48, 1  ;;  %v221_v60 = vadd.f32 %v220_v49, %v219_v41 }
  0x62   :  { %v154_v37 = vrot.slane %v153_v50, 1  ;;  %v165_v38 = vadd.f32 %v164_v51, %v163_v43  ;;  %v216_v63 = vrot.slane %v215_v52, 1  ;;  %v227_v8 = vadd.f32 %v226_v53, %v225_v45 }
  0x63   :  { %v149_v9 = vadd.f32 %v148_v54, %v147_v46  ;;  %v160_v10 = vrot.slane %v159_v56, 1  ;;  %v211_v39 = vadd.f32 %v210_v59, %v209_v48  ;;  %v222_v11 = vrot.slane %v221_v60, 1 }
  0x64   :  { %v155_v16 = vadd.f32 %v154_v37, %v153_v50  ;;  %v166_v19 = vrot.slane %v165_v38, 1  ;;  %v217_v20 = vadd.f32 %v216_v63, %v215_v52  ;;  %v228_v21 = vrot.slane %v227_v8, 1 }
  0x65   :  { %v161_v24 = vadd.f32 %v160_v10, %v159_v56  ;;  %v223_v26 = vadd.f32 %v222_v11, %v221_v60  ;;  %v266_v27 = vmul.f32 %v1045_v58, %v990_v14  ;;  %v267_v28 = vmul.f32 %v1056_v36, %v992_v15 }
  0x66   :  { %v167_v32 = vadd.f32 %v166_v19, %v165_v38  ;;  %v168_v33 = vmax.f32 %v149_v9, %v155_v16  ;;  %v229_v34 = vadd.f32 %v228_v21, %v227_v8  ;;  %v230_v35 = vmax.f32 %v211_v39, %v217_v20 }
  0x67   :  { %v268_v40 = vrot.slane %v1053_v61, 4  ;;  %v274_v41 = vrot.slane %v1064_v62, 4  ;;  %v280_v42 = vrot.slane %v266_v27, 4  ;;  %v286_v43 = vrot.slane %v267_v28, 4 }
  0x68   :  { %v169_v44 = vmax.f32 %v161_v24, %v167_v32  ;;  %v231_v45 = vmax.f32 %v223_v26, %v229_v34  ;;  %v326_v46 = vmul.f32 %v1039_v55, %v995_v17  ;;  %v327_v47 = vmul.f32 %v1042_v57, %v997_v18 }
  0x69   :  { %v269_v48 = vadd.f32 %v268_v40, %v1053_v61  ;;  %v275_v49 = vadd.f32 %v274_v41, %v1064_v62  ;;  %v281_v50 = vadd.f32 %v280_v42, %v266_v27  ;;  %v287_v51 = vadd.f32 %v286_v43, %v267_v28 }
  0x6a   :  { %v170_v52 = vmax.f32 %v168_v33, %v169_v44  ;;  %v232_v53 = vmax.f32 %v230_v35, %v231_v45  ;;  %v328_v54 = vmul.f32 %v1045_v58, %v1002_v22  ;;  %v329_v56 = vmul.f32 %v1056_v36, %v1004_v23 }
  0x6b   :  { %v270_v59 = vrot.slane %v269_v48, 2  ;;  %v276_v60 = vrot.slane %v275_v49, 2  ;;  %v282_v55 = vrot.slane %v281_v50, 2  ;;  %v288_v37 = vrot.slane %v287_v51, 2 }
  0x6c   :  { %v171_v38 = vsub.f32 %v149_v9, %v170_v52  ;;  %v172_v57 = vsub.f32 %v155_v16, %v170_v52  ;;  %v173_v63 = vsub.f32 %v161_v24, %v170_v52  ;;  %v174_v61 = vsub.f32 %v167_v32, %v170_v52 }
  0x6d   :  { %v233_v8 = vsub.f32 %v211_v39, %v232_v53  ;;  %v234_v62 = vsub.f32 %v217_v20, %v232_v53  ;;  %v235_v10 = vsub.f32 %v223_v26, %v232_v53  ;;  %v236_v11 = vsub.f32 %v229_v34, %v232_v53 }
  0x6e   :  { %v175_v19 = vmul.f32 1.442695, %v171_v38  ;;  %v177_v21 = vmul.f32 1.442695, %v172_v57  ;;  %v179_v27 = vmul.f32 1.442695, %v173_v63  ;;  %v271_v28 = vadd.f32 %v270_v59, %v269_v48 }
  0x6f   :  { %v181_v58 = vmul.f32 1.442695, %v174_v61  ;;  %v237_v33 = vmul.f32 1.442695, %v233_v8  ;;  %v239_v35 = vmul.f32 1.442695, %v234_v62  ;;  %v277_v36 = vadd.f32 %v276_v60, %v275_v49 }
  0x70   :  { %733 = vpow2.f32 %v175_v19  ;;  %v241_v40 = vmul.f32 1.442695, %v235_v10  ;;  %v243_v41 = vmul.f32 1.442695, %v236_v11  ;;  %v272_v42 = vrot.slane %v271_v28, 1 }
  0x71   :  { %735 = vpow2.f32 %v177_v21  ;;  %v278_v9 = vrot.slane %v277_v36, 1  ;;  %v283_v16 = vadd.f32 %v282_v55, %v281_v50  ;;  %v289_v24 = vadd.f32 %v288_v37, %v287_v51 }
  0x72   :  { %737 = vpow2.f32 %v179_v27  ;;  %v273_v39 = vadd.f32 %v272_v42, %v271_v28  ;;  %v330_v20 = vrot.slane %v326_v46, 4  ;;  %v336_v26 = vrot.slane %v327_v47, 4 }
  0x73   :  { %739 = vpow2.f32 %v181_v58  ;;  %v279_v32 = vadd.f32 %v278_v9, %v277_v36  ;;  %v284_v34 = vrot.slane %v283_v16, 1  ;;  %v290_v43 = vrot.slane %v289_v24, 1 }
  0x74   :  { %741 = vpow2.f32 %v237_v33  ;;  %v331_v44 = vadd.f32 %v330_v20, %v326_v46  ;;  %v337_v45 = vadd.f32 %v336_v26, %v327_v47  ;;  %v342_v48 = vrot.slane %v328_v54, 4 }
  0x75   :  { %743 = vpow2.f32 %v239_v35  ;;  %v285_v49 = vadd.f32 %v284_v34, %v283_v16  ;;  %v291_v52 = vadd.f32 %v290_v43, %v289_v24  ;;  %v292_v53 = vmax.f32 %v273_v39, %v279_v32 }
  0x76   :  { %745 = vpow2.f32 %v241_v40  ;;  %v332_v59 = vrot.slane %v331_v44, 2  ;;  %v338_v50 = vrot.slane %v337_v45, 2  ;;  %v343_v51 = vadd.f32 %v342_v48, %v328_v54 }
  0x77   :  { %v293_v60 = vmax.f32 %v285_v49, %v291_v52  ;;  %v348_v55 = vrot.slane %v329_v56, 4  ;;  %747 = vpow2.f32 %v243_v41 }
  0x78   :  { %v333_v37 = vadd.f32 %v332_v59, %v331_v44  ;;  %v339_v38 = vadd.f32 %v338_v50, %v337_v45  ;;  %v344_v57 = vrot.slane %v343_v51, 2 }
  0x79   :  { %v294_v63 = vmax.f32 %v292_v53, %v293_v60  ;;  %v349_v8 = vadd.f32 %v348_v55, %v329_v56 }
  0x7a   :  { %v1090_v61 = vpop.eup %733  ;;  %v334_v46 = vrot.slane %v333_v37, 1  ;;  %v345_v47 = vadd.f32 %v344_v57, %v343_v51  ;;  %v340_v28 = vrot.slane %v339_v38, 1 }
  0x7b   :  { %v1092_v62 = vpop.eup %735  ;;  %v295_v10 = vsub.f32 %v273_v39, %v294_v63  ;;  %v296_v11 = vsub.f32 %v279_v32, %v294_v63  ;;  %v297_v19 = vsub.f32 %v285_v49, %v294_v63  ;;  %v298_v21 = vsub.f32 %v291_v52, %v294_v63 }
  0x7c   :  { %v1094_v27 = vpop.eup %737  ;;  %v183_v54 = vadd.f32 %v1092_v62, %v1090_v61  ;;  %v346_v41 = vrot.slane %v345_v47, 1  ;;  %v350_v42 = vrot.slane %v349_v8, 2  ;;  %v335_v24 = vadd.f32 %v334_v46, %v333_v37 }
  0x7d   :  { %v1098_v58 = vpop.eup %739  ;;  %v299_v33 = vmul.f32 1.442695, %v295_v10  ;;  %v301_v35 = vmul.f32 1.442695, %v296_v11  ;;  %v303_v36 = vmul.f32 1.442695, %v297_v19  ;;  %v341_v26 = vadd.f32 %v340_v28, %v339_v38 }
  0x7e   :  { %v1100_v40 = vpop.eup %741  ;;  %v184_v56 = vadd.f32 %v1094_v27, %v183_v54  ;;  %v305_v16 = vmul.f32 1.442695, %v298_v21  ;;  %v351_v32 = vadd.f32 %v350_v42, %v349_v8  ;;  %v347_v45 = vadd.f32 %v346_v41, %v345_v47 }
  0x7f   :  { %v1103_v9 = vpop.eup %743  ;;  %749 = vpow2.f32 %v299_v33  ;;  %v354_v52 = vmax.f32 %v335_v24, %v341_v26 }
  0x80   :  { %v1105_v39 = vpop.eup %745  ;;  %v245_v20 = vadd.f32 %v1103_v9, %v1100_v40  ;;  %751 = vpow2.f32 %v301_v35  ;;  %v185_v34 = vadd.f32 %v1098_v58, %v184_v56  ;;  %v352_v48 = vrot.slane %v351_v32, 1 }
  0x81   :  { %753 = vpow2.f32 %v303_v36  ;;  %v748_v43 = vpop.eup %747 }
  0x82   :  { %v246_v44 = vadd.f32 %v1105_v39, %v245_v20  ;;  %755 = vpow2.f32 %v305_v16  ;;  %v353_v49 = vadd.f32 %v352_v48, %v351_v32 }
  0x83   :  { %757 = vrcp.f32 %v185_v34 }
  0x84   :  { %v247_v53 = vadd.f32 %v748_v43, %v246_v44  ;;  %v355_v59 = vmax.f32 %v347_v45, %v353_v49 }
  0x86   :  { %v356_v50 = vmax.f32 %v354_v52, %v355_v59  ;;  %759 = vrcp.f32 %v247_v53 }
  0x88   :  { %v357_v55 = vsub.f32 %v335_v24, %v356_v50  ;;  %v358_v37 = vsub.f32 %v341_v26, %v356_v50  ;;  %v359_v38 = vsub.f32 %v347_v45, %v356_v50  ;;  %v360_v57 = vsub.f32 %v353_v49, %v356_v50 }
  0x89   :  { %v750_v51 = vpop.eup %749 }
  0x8a   :  { %v752_v60 = vpop.eup %751  ;;  %v361_v8 = vmul.f32 1.442695, %v357_v55  ;;  %v363_v10 = vmul.f32 1.442695, %v358_v37  ;;  %v365_v47 = vmul.f32 1.442695, %v359_v38 }
  0x8b   :  { %v754_v63 = vpop.eup %753  ;;  %v307_v46 = vadd.f32 %v752_v60, %v750_v51  ;;  %v367_v21 = vmul.f32 1.442695, %v360_v57 }
  0x8c   :  { %v756_v11 = vpop.eup %755  ;;  %761 = vpow2.f32 %v361_v8 }
  0x8d   :  { %v308_v19 = vadd.f32 %v754_v63, %v307_v46  ;;  %v758_v54 = vpop.eup %757  ;;  %763 = vpow2.f32 %v363_v10 }
  0x8e   :  { %765 = vpow2.f32 %v365_v47  ;;  %v187_v33 = vmul.f32 %v758_v54, %v185_v34 }
  0x8f   :  { %v309_v28 = vadd.f32 %v756_v11, %v308_v19 }
  0x90   :  { %v760_v35 = vpop.eup %759  ;;  %v188_v36 = vsub.f32 2.0, %v187_v33 }
  0x91   :  { %767 = vrcp.f32 %v309_v28  ;;  %v249_v56 = vmul.f32 %v760_v35, %v247_v53 }
  0x92   :  { %769 = vpow2.f32 %v367_v21  ;;  %v189_v24 = vmul.f32 %v758_v54, %v188_v36 }
  0x93   :  { %v250_v26 = vsub.f32 2.0, %v249_v56 }
  0x94   :  { %v190_v49 = vmul.f32 %v1090_v61, %v189_v24  ;;  %v191_v52 = vmul.f32 %v1092_v62, %v189_v24  ;;  %v192_v34 = vmul.f32 %v1094_v27, %v189_v24  ;;  %v193_v53 = vmul.f32 %v1098_v58, %v189_v24 }
  0x95   :  { %v251_v59 = vmul.f32 %v760_v35, %v250_v26 }
  0x96   :  { %v762_v41 = vpop.eup %761  ;;  %v194_v37 = vmul.f32 %v190_v49, %v962_v0  ;;  %v195_v38 = vmul.f32 %v191_v52, %v964_v1  ;;  %v196_v57 = vmul.f32 %v192_v34, %v966_v2  ;;  %v197_v61 = vmul.f32 %v193_v53, %v968_v3 }
  0x97   :  { %v764_v42 = vpop.eup %763  ;;  %v252_v46 = vmul.f32 %v1100_v40, %v251_v59  ;;  %v253_v62 = vmul.f32 %v1103_v9, %v251_v59  ;;  %v254_v27 = vmul.f32 %v1105_v39, %v251_v59  ;;  %v255_v8 = vmul.f32 %v748_v43, %v251_v59 }
  0x98   :  { %v766_v16 = vpop.eup %765  ;;  %v369_v32 = vadd.f32 %v764_v42, %v762_v41  ;;  %v198_v58 = vadd.f32 %v194_v37, %v1007_v25  ;;  %v199_v47 = vadd.f32 %v195_v38, %v1012_v29  ;;  %v200_v19 = vadd.f32 %v196_v57, %v1014_v30 }
  0x99   :  { %v256_v21 = vmul.f32 %v252_v46, %v970_v4  ;;  %v201_v54 = vadd.f32 %v197_v61, %v1016_v31  ;;  %v257_v40 = vmul.f32 %v253_v62, %v972_v5  ;;  %v259_v9 = vmul.f32 %v255_v8, %v976_v7 }
  0x9a   :  { %v370_v48 = vadd.f32 %v766_v16, %v369_v32 }
  0x9b   :  { %v768_v20 = vpop.eup %767  ;;  %v260_v25 = vadd.f32 %v256_v21, %v198_v58  ;;  %v261_v56 = vadd.f32 %v257_v40, %v199_v47  ;;  %v263_v24 = vadd.f32 %v259_v9, %v201_v54 }
  0x9c   :  { %v770_v44 = vpop.eup %769  ;;  %v311_v45 = vmul.f32 %v768_v20, %v309_v28  ;;  %v258_v28 = vmul.f32 %v254_v27, %v974_v6 }
  0x9d   :  { %v371_v50 = vadd.f32 %v770_v44, %v370_v48 }
  0x9e   :  { %v312_v55 = vsub.f32 2.0, %v311_v45  ;;  %v262_v29 = vadd.f32 %v258_v28, %v200_v19 }
  0x9f   :  { %771 = vrcp.f32 %v371_v50 }
  0xa0   :  { %v313_v10 = vmul.f32 %v768_v20, %v312_v55 }
  0xa2   :  { %v314_v33 = vmul.f32 %v750_v51, %v313_v10  ;;  %v315_v39 = vmul.f32 %v752_v60, %v313_v10  ;;  %v316_v43 = vmul.f32 %v754_v63, %v313_v10  ;;  %v317_v35 = vmul.f32 %v756_v11, %v313_v10 }
  0xa4   :  { %v318_v20 = vmul.f32 %v314_v33, %v986_v12  ;;  %v319_v31 = vmul.f32 %v315_v39, %v988_v13  ;;  %v320_v26 = vmul.f32 %v316_v43, %v990_v14  ;;  %v321_v32 = vmul.f32 %v317_v35, %v992_v15 }
  0xa6   :  { %v322_v51 = vadd.f32 %v318_v20, %v260_v25  ;;  %v323_v60 = vadd.f32 %v319_v31, %v261_v56  ;;  %v324_v63 = vadd.f32 %v320_v26, %v262_v29  ;;  %v325_v11 = vadd.f32 %v321_v32, %v263_v24 }
  0xa9   :  { %v772_v36 = vpop.eup %771 }
  0xaa   :  { %v373_v30 = vmul.f32 %v772_v36, %v371_v50 }
  0xac   :  { %v374_v45 = vsub.f32 2.0, %v373_v30 }
  0xae   :  { %v375_v48 = vmul.f32 %v772_v36, %v374_v45 }
  0xb0   :  { %v376_v49 = vmul.f32 %v762_v41, %v375_v48  ;;  %v377_v52 = vmul.f32 %v764_v42, %v375_v48  ;;  %v378_v34 = vmul.f32 %v766_v16, %v375_v48  ;;  %v379_v59 = vmul.f32 %v770_v44, %v375_v48 }
  0xb2   :  { %v380_v50 = vmul.f32 %v376_v49, %v995_v17  ;;  %v381_v53 = vmul.f32 %v377_v52, %v997_v18  ;;  %v382_v55 = vmul.f32 %v378_v34, %v1002_v22  ;;  %v383_v37 = vmul.f32 %v379_v59, %v1004_v23 }
  0xb4   :  { %v1138_v38 = vadd.f32 %v380_v50, %v322_v51  ;;  %v1140_v57 = vadd.f32 %v381_v53, %v323_v60  ;;  %v1142_v46 = vadd.f32 %v382_v55, %v324_v63  ;;  %v1144_v61 = vadd.f32 %v383_v37, %v325_v11 }
  0xb6   :  { %v388_v41 = vmul.f32 %v1138_v38, %v1138_v38  ;;  %v389_v42 = vmul.f32 %v1140_v57, %v1140_v57  ;;  %v390_v16 = vmul.f32 %v1142_v46, %v1142_v46  ;;  %v391_v44 = vmul.f32 %v1144_v61, %v1144_v61 }
  0xb8   :  { %v392_v62 = vrot.slane %v388_v41, 4  ;;  %v398_v27 = vrot.slane %v389_v42, 4  ;;  %v404_v8 = vrot.slane %v390_v16, 4  ;;  %v410_v10 = vrot.slane %v391_v44, 4 }
  0xba   :  { %v393_v58 = vadd.f32 %v392_v62, %v388_v41  ;;  %v399_v47 = vadd.f32 %v398_v27, %v389_v42  ;;  %v405_v19 = vadd.f32 %v404_v8, %v390_v16  ;;  %v411_v21 = vadd.f32 %v410_v10, %v391_v44 }
  0xbc   :  { %v394_v54 = vrot.slane %v393_v58, 2  ;;  %v400_v40 = vrot.slane %v399_v47, 2  ;;  %v406_v28 = vrot.slane %v405_v19, 2  ;;  %v412_v9 = vrot.slane %v411_v21, 2 }
  0xbe   :  { %v395_v33 = vadd.f32 %v394_v54, %v393_v58  ;;  %v401_v39 = vadd.f32 %v400_v40, %v399_v47  ;;  %v407_v43 = vadd.f32 %v406_v28, %v405_v19  ;;  %v413_v35 = vadd.f32 %v412_v9, %v411_v21 }
  0xc0   :  { %v396_v36 = vrot.slane %v395_v33, 1  ;;  %v402_v25 = vrot.slane %v401_v39, 1  ;;  %v408_v56 = vrot.slane %v407_v43, 1  ;;  %v414_v29 = vrot.slane %v413_v35, 1 }
  0xc2   :  { %v397_v24 = vadd.f32 %v396_v36, %v395_v33  ;;  %v403_v30 = vadd.f32 %v402_v25, %v401_v39  ;;  %v409_v20 = vadd.f32 %v408_v56, %v407_v43  ;;  %v415_v31 = vadd.f32 %v414_v29, %v413_v35 }
  0xc4   :  { %v416_v26 = vmax.f32 %v397_v24, 1e-24  ;;  %v417_v32 = vmax.f32 %v403_v30, 1e-24  ;;  %v418_v45 = vmax.f32 %v409_v20, 1e-24 }
  0xc5   :  { %v419_v48 = vmax.f32 %v415_v31, 1e-24 }
  0xc6   :  { %773 = vrsqrt.f32 %v416_v26  ;;  %v424_v51 = vmul.f32 0.5, %v416_v26  ;;  %v425_v60 = vmul.f32 0.5, %v417_v32  ;;  %v426_v63 = vmul.f32 0.5, %v418_v45 }
  0xc7   :  { %775 = vrsqrt.f32 %v417_v32  ;;  %v427_v49 = vmul.f32 0.5, %v419_v48 }
  0xc8   :  { %777 = vrsqrt.f32 %v418_v45 }
  0xc9   :  { %779 = vrsqrt.f32 %v419_v48 }
  0xd0   :  { %v774_v11 = vpop.eup %773 }
  0xd1   :  { %v776_v52 = vpop.eup %775  ;;  %v428_v34 = vmul.f32 %v774_v11, %v424_v51 }
  0xd2   :  { %v778_v59 = vpop.eup %777  ;;  %v429_v50 = vmul.f32 %v776_v52, %v425_v60 }
  0xd3   :  { %v780_v53 = vpop.eup %779  ;;  %v430_v55 = vmul.f32 %v778_v59, %v426_v63  ;;  %v432_v37 = vmul.f32 %v774_v11, %v428_v34 }
  0xd4   :  { %v431_v41 = vmul.f32 %v780_v53, %v427_v49  ;;  %v433_v42 = vmul.f32 %v776_v52, %v429_v50 }
  0xd5   :  { %v434_v16 = vmul.f32 %v778_v59, %v430_v55  ;;  %v436_v44 = vsub.f32 1.5, %v432_v37 }
  0xd6   :  { %v435_v62 = vmul.f32 %v780_v53, %v431_v41  ;;  %v437_v27 = vsub.f32 1.5, %v433_v42 }
  0xd7   :  { %v438_v8 = vsub.f32 1.5, %v434_v16  ;;  %v440_v10 = vmul.f32 %v774_v11, %v436_v44 }
  0xd8   :  { %v439_v58 = vsub.f32 1.5, %v435_v62  ;;  %v441_v47 = vmul.f32 %v776_v52, %v437_v27 }
  0xd9   :  { %v442_v19 = vmul.f32 %v778_v59, %v438_v8  ;;  %v1155_v21 = vmul.f32 %v440_v10, %v1138_v38 }
  0xda   :  { %v443_v54 = vmul.f32 %v780_v53, %v439_v58  ;;  %v1158_v40 = vmul.f32 %v441_v47, %v1140_v57 }
  0xdb   :  { %v1161_v28 = vmul.f32 %v442_v19, %v1142_v46  ;;  %v448_v9 = vmul.f32 %v1155_v21, %v962_v0  ;;  %v510_v33 = vmul.f32 %v1155_v21, %v970_v4  ;;  %v1169_v39 = vmul.f32 %v1155_v21, %v986_v12 }
  0xdc   :  { %v1172_v38 = vmul.f32 %v443_v54, %v1144_v61  ;;  %v449_v57 = vmul.f32 %v1158_v40, %v964_v1  ;;  %v511_v46 = vmul.f32 %v1158_v40, %v972_v5  ;;  %v1180_v43 = vmul.f32 %v1158_v40, %v988_v13 }
  0xdd   :  { %v450_v0 = vmul.f32 %v1161_v28, %v966_v2  ;;  %v452_v4 = vrot.slane %v448_v9, 4  ;;  %v512_v12 = vmul.f32 %v1161_v28, %v974_v6  ;;  %v514_v35 = vrot.slane %v510_v33, 4 }
  0xde   :  { %v451_v61 = vmul.f32 %v1172_v38, %v968_v3  ;;  %v458_v36 = vrot.slane %v449_v57, 4  ;;  %v513_v1 = vmul.f32 %v1172_v38, %v976_v7  ;;  %v520_v5 = vrot.slane %v511_v46, 4 }
  0xdf   :  { %v453_v25 = vadd.f32 %v452_v4, %v448_v9  ;;  %v464_v56 = vrot.slane %v450_v0, 4  ;;  %v515_v13 = vadd.f32 %v514_v35, %v510_v33  ;;  %v526_v29 = vrot.slane %v512_v12, 4 }
  0xe0   :  { %v459_v24 = vadd.f32 %v458_v36, %v449_v57  ;;  %v470_v30 = vrot.slane %v451_v61, 4  ;;  %v521_v2 = vadd.f32 %v520_v5, %v511_v46  ;;  %v532_v20 = vrot.slane %v513_v1, 4 }
  0xe1   :  { %v454_v31 = vrot.slane %v453_v25, 2  ;;  %v465_v26 = vadd.f32 %v464_v56, %v450_v0  ;;  %v516_v6 = vrot.slane %v515_v13, 2  ;;  %v527_v32 = vadd.f32 %v526_v29, %v512_v12 }
  0xe2   :  { %v460_v45 = vrot.slane %v459_v24, 2  ;;  %v471_v48 = vadd.f32 %v470_v30, %v451_v61  ;;  %v522_v3 = vrot.slane %v521_v2, 2  ;;  %v533_v51 = vadd.f32 %v532_v20, %v513_v1 }
  0xe3   :  { %v455_v60 = vadd.f32 %v454_v31, %v453_v25  ;;  %v466_v63 = vrot.slane %v465_v26, 2  ;;  %v517_v7 = vadd.f32 %v516_v6, %v515_v13  ;;  %v528_v11 = vrot.slane %v527_v32, 2 }
  0xe4   :  { %v461_v49 = vadd.f32 %v460_v45, %v459_v24  ;;  %v472_v52 = vrot.slane %v471_v48, 2  ;;  %v523_v34 = vadd.f32 %v522_v3, %v521_v2  ;;  %v534_v59 = vrot.slane %v533_v51, 2 }
  0xe5   :  { %v456_v50 = vrot.slane %v455_v60, 1  ;;  %v467_v53 = vadd.f32 %v466_v63, %v465_v26  ;;  %v518_v55 = vrot.slane %v517_v7, 1  ;;  %v529_v37 = vadd.f32 %v528_v11, %v527_v32 }
  0xe6   :  { %v462_v41 = vrot.slane %v461_v49, 1  ;;  %v473_v42 = vadd.f32 %v472_v52, %v471_v48  ;;  %v524_v16 = vrot.slane %v523_v34, 1  ;;  %v535_v44 = vadd.f32 %v534_v59, %v533_v51 }
  0xe7   :  { %v457_v62 = vadd.f32 %v456_v50, %v455_v60  ;;  %v468_v27 = vrot.slane %v467_v53, 1  ;;  %v519_v8 = vadd.f32 %v518_v55, %v517_v7  ;;  %v530_v10 = vrot.slane %v529_v37, 1 }
  0xe8   :  { %v463_v58 = vadd.f32 %v462_v41, %v461_v49  ;;  %v474_v47 = vrot.slane %v473_v42, 1  ;;  %v525_v19 = vadd.f32 %v524_v16, %v523_v34  ;;  %v536_v54 = vrot.slane %v535_v44, 1 }
  0xe9   :  { %v469_v9 = vadd.f32 %v468_v27, %v467_v53  ;;  %v531_v33 = vadd.f32 %v530_v10, %v529_v37  ;;  %v574_v57 = vmul.f32 %v1161_v28, %v990_v14  ;;  %v575_v46 = vmul.f32 %v1172_v38, %v992_v15 }
  0xea   :  { %v475_v0 = vadd.f32 %v474_v47, %v473_v42  ;;  %v476_v4 = vmax.f32 %v457_v62, %v463_v58  ;;  %v537_v12 = vadd.f32 %v536_v54, %v535_v44  ;;  %v538_v35 = vmax.f32 %v519_v8, %v525_v19 }
  0xeb   :  { %v576_v61 = vrot.slane %v1169_v39, 4  ;;  %v582_v36 = vrot.slane %v1180_v43, 4  ;;  %v588_v1 = vrot.slane %v574_v57, 4  ;;  %v594_v5 = vrot.slane %v575_v46, 4 }
  0xec   :  { %v477_v25 = vmax.f32 %v469_v9, %v475_v0  ;;  %v539_v56 = vmax.f32 %v531_v33, %v537_v12  ;;  %v634_v13 = vmul.f32 %v1155_v21, %v995_v17  ;;  %v635_v14 = vmul.f32 %v1158_v40, %v997_v18 }
  0xed   :  { %v577_v15 = vadd.f32 %v576_v61, %v1169_v39  ;;  %v583_v29 = vadd.f32 %v582_v36, %v1180_v43  ;;  %v589_v24 = vadd.f32 %v588_v1, %v574_v57  ;;  %v595_v30 = vadd.f32 %v594_v5, %v575_v46 }
  0xee   :  { %v478_v2 = vmax.f32 %v476_v4, %v477_v25  ;;  %v540_v20 = vmax.f32 %v538_v35, %v539_v56  ;;  %v636_v31 = vmul.f32 %v1161_v28, %v1002_v22  ;;  %v637_v26 = vmul.f32 %v1172_v38, %v1004_v23 }
  0xef   :  { %v578_v6 = vrot.slane %v577_v15, 2  ;;  %v584_v32 = vrot.slane %v583_v29, 2  ;;  %v590_v17 = vrot.slane %v589_v24, 2  ;;  %v596_v21 = vrot.slane %v595_v30, 2 }
  0xf0   :  { %v479_v45 = vsub.f32 %v457_v62, %v478_v2  ;;  %v480_v18 = vsub.f32 %v463_v58, %v478_v2  ;;  %v481_v40 = vsub.f32 %v469_v9, %v478_v2  ;;  %v482_v39 = vsub.f32 %v475_v0, %v478_v2 }
  0xf1   :  { %v541_v48 = vsub.f32 %v519_v8, %v540_v20  ;;  %v542_v43 = vsub.f32 %v525_v19, %v540_v20  ;;  %v543_v3 = vsub.f32 %v531_v33, %v540_v20  ;;  %v544_v51 = vsub.f32 %v537_v12, %v540_v20 }
  0xf2   :  { %v483_v60 = vmul.f32 1.442695, %v479_v45  ;;  %v485_v63 = vmul.f32 1.442695, %v480_v18  ;;  %v487_v7 = vmul.f32 1.442695, %v481_v40  ;;  %v579_v11 = vadd.f32 %v578_v6, %v577_v15 }
  0xf3   :  { %v489_v22 = vmul.f32 1.442695, %v482_v39  ;;  %v545_v28 = vmul.f32 1.442695, %v541_v48  ;;  %v547_v49 = vmul.f32 1.442695, %v542_v43  ;;  %v585_v23 = vadd.f32 %v584_v32, %v583_v29 }
  0xf4   :  { %781 = vpow2.f32 %v483_v60  ;;  %v549_v38 = vmul.f32 1.442695, %v543_v3  ;;  %v551_v52 = vmul.f32 1.442695, %v544_v51  ;;  %v580_v34 = vrot.slane %v579_v11, 1 }
  0xf5   :  { %783 = vpow2.f32 %v485_v63  ;;  %v586_v59 = vrot.slane %v585_v23, 1  ;;  %v591_v50 = vadd.f32 %v590_v17, %v589_v24  ;;  %v597_v53 = vadd.f32 %v596_v21, %v595_v30 }
  0xf6   :  { %785 = vpow2.f32 %v487_v7  ;;  %v581_v55 = vadd.f32 %v580_v34, %v579_v11  ;;  %v638_v37 = vrot.slane %v634_v13, 4  ;;  %v644_v41 = vrot.slane %v635_v14, 4 }
  0xf7   :  { %787 = vpow2.f32 %v489_v22  ;;  %v587_v42 = vadd.f32 %v586_v59, %v585_v23  ;;  %v592_v16 = vrot.slane %v591_v50, 1  ;;  %v598_v44 = vrot.slane %v597_v53, 1 }
  0xf8   :  { %789 = vpow2.f32 %v545_v28  ;;  %v639_v62 = vadd.f32 %v638_v37, %v634_v13  ;;  %v645_v27 = vadd.f32 %v644_v41, %v635_v14  ;;  %v650_v8 = vrot.slane %v636_v31, 4 }
  0xf9   :  { %791 = vpow2.f32 %v547_v49  ;;  %v593_v10 = vadd.f32 %v592_v16, %v591_v50  ;;  %v599_v58 = vadd.f32 %v598_v44, %v597_v53  ;;  %v600_v47 = vmax.f32 %v581_v55, %v587_v42 }
  0xfa   :  { %793 = vpow2.f32 %v549_v38  ;;  %v640_v19 = vrot.slane %v639_v62, 2  ;;  %v646_v54 = vrot.slane %v645_v27, 2  ;;  %v651_v9 = vadd.f32 %v650_v8, %v636_v31 }
  0xfb   :  { %v601_v33 = vmax.f32 %v593_v10, %v599_v58  ;;  %v656_v57 = vrot.slane %v637_v26, 4  ;;  %795 = vpow2.f32 %v551_v52 }
  0xfc   :  { %v641_v46 = vadd.f32 %v640_v19, %v639_v62  ;;  %v647_v0 = vadd.f32 %v646_v54, %v645_v27  ;;  %v652_v4 = vrot.slane %v651_v9, 2 }
  0xfd   :  { %v602_v12 = vmax.f32 %v600_v47, %v601_v33  ;;  %v657_v1 = vadd.f32 %v656_v57, %v637_v26 }
  0xfe   :  { %v1206_v35 = vpop.eup %781  ;;  %v642_v61 = vrot.slane %v641_v46, 1  ;;  %v653_v36 = vadd.f32 %v652_v4, %v651_v9  ;;  %v648_v24 = vrot.slane %v647_v0, 1 }
  0xff   :  { %v1208_v5 = vpop.eup %783  ;;  %v603_v25 = vsub.f32 %v581_v55, %v602_v12  ;;  %v604_v56 = vsub.f32 %v587_v42, %v602_v12  ;;  %v605_v13 = vsub.f32 %v593_v10, %v602_v12  ;;  %v606_v14 = vsub.f32 %v599_v58, %v602_v12 }
 0x100   :  { %v1210_v15 = vpop.eup %785  ;;  %v491_v29 = vadd.f32 %v1208_v5, %v1206_v35  ;;  %v654_v32 = vrot.slane %v653_v36, 1  ;;  %v658_v17 = vrot.slane %v657_v1, 2  ;;  %v643_v18 = vadd.f32 %v642_v61, %v641_v46 }
 0x101   :  { %v1214_v30 = vpop.eup %787  ;;  %v607_v2 = vmul.f32 1.442695, %v603_v25  ;;  %v609_v20 = vmul.f32 1.442695, %v604_v56  ;;  %v611_v31 = vmul.f32 1.442695, %v605_v13  ;;  %v649_v48 = vadd.f32 %v648_v24, %v647_v0 }
 0x102   :  { %v1216_v6 = vpop.eup %789  ;;  %v492_v26 = vadd.f32 %v1210_v15, %v491_v29  ;;  %v613_v45 = vmul.f32 1.442695, %v606_v14  ;;  %v659_v43 = vadd.f32 %v658_v17, %v657_v1  ;;  %v655_v63 = vadd.f32 %v654_v32, %v653_v36  ;;  %v823_v17 = vld [vmem:[#allocation5 + $0x40] sm:$0xff] }
 0x103   :  { %v1219_v21 = vpop.eup %791  ;;  %797 = vpow2.f32 %v607_v2  ;;  %v662_v22 = vmax.f32 %v643_v18, %v649_v48 }
 0x104   :  { %v1221_v40 = vpop.eup %793  ;;  %v553_v39 = vadd.f32 %v1219_v21, %v1216_v6  ;;  %799 = vpow2.f32 %v609_v20  ;;  %v493_v3 = vadd.f32 %v1214_v30, %v492_v26  ;;  %v660_v7 = vrot.slane %v659_v43, 1  ;;  %v821_v20 = vld [vmem:[#allocation5] sm:$0xff] }
 0x105   :  { %801 = vpow2.f32 %v611_v31  ;;  %v1226_v51 = vpop.eup %795  ;;  %v822_v26 = vld [vmem:[#allocation5 + $0x20] sm:$0xff] }
 0x106   :  { %v554_v60 = vadd.f32 %v1221_v40, %v553_v39  ;;  %803 = vpow2.f32 %v613_v45  ;;  %v661_v11 = vadd.f32 %v660_v7, %v659_v43  ;;  %v827_v7 = vld [vmem:[#allocation2 + $0x10] sm:$0xff] }
 0x107   :  { %805 = vrcp.f32 %v493_v3 }
 0x108   :  { %v555_v28 = vadd.f32 %v1226_v51, %v554_v60  ;;  %v663_v49 = vmax.f32 %v655_v63, %v661_v11  ;;  %v826_v60 = vld [vmem:[#allocation2 + $0x8] sm:$0xff] }
 0x10a   :  { %v664_v23 = vmax.f32 %v662_v22, %v663_v49  ;;  %807 = vrcp.f32 %v555_v28  ;;  %v828_v22 = vld [vmem:[#allocation5 + $0x8] sm:$0xff]  ;;  %v829_v49 = vld [vmem:[#allocation2 + $0x18] sm:$0xff] }
 0x10c   :  { %v665_v34 = vsub.f32 %v643_v18, %v664_v23  ;;  %v666_v59 = vsub.f32 %v649_v48, %v664_v23  ;;  %v667_v50 = vsub.f32 %v655_v63, %v664_v23  ;;  %v668_v53 = vsub.f32 %v661_v11, %v664_v23 }
 0x10d   :  { %v1230_v38 = vpop.eup %797 }
 0x10e   :  { %v1232_v52 = vpop.eup %799  ;;  %v669_v41 = vmul.f32 1.442695, %v665_v34  ;;  %v671_v42 = vmul.f32 1.442695, %v666_v59  ;;  %v673_v16 = vmul.f32 1.442695, %v667_v50 }
 0x10f   :  { %v1234_v55 = vpop.eup %801  ;;  %v615_v37 = vadd.f32 %v1232_v52, %v1230_v38  ;;  %v675_v27 = vmul.f32 1.442695, %v668_v53  ;;  %v831_v59 = vld [vmem:[#allocation5 + $0x48] sm:$0xff] }
 0x110   :  { %v1238_v44 = vpop.eup %803  ;;  %809 = vpow2.f32 %v669_v41 }
 0x111   :  { %v616_v62 = vadd.f32 %v1234_v55, %v615_v37  ;;  %v806_v8 = vpop.eup %805  ;;  %811 = vpow2.f32 %v671_v42 }
 0x112   :  { %813 = vpow2.f32 %v673_v16  ;;  %v495_v58 = vmul.f32 %v806_v8, %v493_v3 }
 0x113   :  { %v617_v10 = vadd.f32 %v1238_v44, %v616_v62 }
 0x114   :  { %v808_v47 = vpop.eup %807  ;;  %v496_v19 = vsub.f32 2.0, %v495_v58  ;;  %v833_v58 = vld [vmem:[#allocation5 + $0x10] sm:$0xff] }
 0x115   :  { %815 = vrcp.f32 %v617_v10  ;;  %v557_v54 = vmul.f32 %v808_v47, %v555_v28 }
 0x116   :  { %817 = vpow2.f32 %v675_v27  ;;  %v497_v46 = vmul.f32 %v806_v8, %v496_v19  ;;  %v834_v19 = vld [vmem:[#allocation5 + $0x30] sm:$0xff] }
 0x117   :  { %v558_v4 = vsub.f32 2.0, %v557_v54 }
 0x118   :  { %v498_v25 = vmul.f32 %v1206_v35, %v497_v46  ;;  %v499_v56 = vmul.f32 %v1208_v5, %v497_v46  ;;  %v500_v13 = vmul.f32 %v1210_v15, %v497_v46  ;;  %v501_v24 = vmul.f32 %v1214_v30, %v497_v46  ;;  %v824_v35 = vld [vmem:[#allocation5 + $0x60] sm:$0xff]  ;;  %v835_v46 = vld [vmem:[#allocation5 + $0x50] sm:$0xff] }
 0x119   :  { %v559_v14 = vmul.f32 %v808_v47, %v558_v4  ;;  %v825_v30 = vld [vmem:[#allocation2] sm:$0xff]  ;;  %v836_v4 = vld [vmem:[#allocation5 + $0x70] sm:$0xff] }
 0x11a   :  { %v1242_v9 = vpop.eup %809  ;;  %v502_v31 = vmul.f32 %v821_v20, %v498_v25  ;;  %v503_v32 = vmul.f32 %v822_v26, %v499_v56  ;;  %v504_v45 = vmul.f32 %v823_v17, %v500_v13  ;;  %v505_v39 = vmul.f32 %v824_v35, %v501_v24 }
 0x11b   :  { %v1244_v33 = vpop.eup %811  ;;  %v560_v18 = vmul.f32 %v1216_v6, %v559_v14  ;;  %v561_v5 = vmul.f32 %v1219_v21, %v559_v14  ;;  %v562_v15 = vmul.f32 %v1221_v40, %v559_v14  ;;  %v563_v48 = vmul.f32 %v1226_v51, %v559_v14  ;;  %v830_v6 = vld [vmem:[#allocation5 + $0x28] sm:$0xff] }
 0x11c   :  { %v1246_v57 = vpop.eup %813  ;;  %v677_v12 = vadd.f32 %v1244_v33, %v1242_v9  ;;  %v506_v3 = vadd.f32 %v825_v30, %v502_v31  ;;  %v507_v63 = vadd.f32 %v826_v60, %v503_v32  ;;  %v508_v11 = vadd.f32 %v827_v7, %v504_v45  ;;  %v832_v21 = vld [vmem:[#allocation5 + $0x68] sm:$0xff]  ;;  %v839_v31 = vld [vmem:[#allocation5 + $0x58] sm:$0xff] }
 0x11d   :  { %v564_v28 = vmul.f32 %v828_v22, %v560_v18  ;;  %v509_v23 = vadd.f32 %v829_v49, %v505_v39  ;;  %v565_v34 = vmul.f32 %v830_v6, %v561_v5  ;;  %v566_v50 = vmul.f32 %v831_v59, %v562_v15  ;;  %v840_v32 = vld [vmem:[#allocation5 + $0x78] sm:$0xff] }
 0x11e   :  { %v678_v1 = vadd.f32 %v1246_v57, %v677_v12  ;;  %v567_v53 = vmul.f32 %v832_v21, %v563_v48 }
 0x11f   :  { %v816_v0 = vpop.eup %815  ;;  %v568_v16 = vadd.f32 %v564_v28, %v506_v3  ;;  %v569_v62 = vadd.f32 %v565_v34, %v507_v63  ;;  %v570_v27 = vadd.f32 %v566_v50, %v508_v11 }
 0x120   :  { %v1250_v61 = vpop.eup %817  ;;  %v619_v36 = vmul.f32 %v816_v0, %v617_v10  ;;  %v571_v8 = vadd.f32 %v567_v53, %v509_v23 }
 0x121   :  { %v679_v29 = vadd.f32 %v1250_v61, %v678_v1 }
 0x122   :  { %v620_v2 = vsub.f32 2.0, %v619_v36 }
 0x123   :  { %819 = vrcp.f32 %v679_v29 }
 0x124   :  { %v621_v43 = vmul.f32 %v816_v0, %v620_v2  ;;  %v838_v2 = vld [vmem:[#allocation5 + $0x38] sm:$0xff] }
 0x126   :  { %v622_v40 = vmul.f32 %v1230_v38, %v621_v43  ;;  %v623_v51 = vmul.f32 %v1232_v52, %v621_v43  ;;  %v624_v37 = vmul.f32 %v1234_v55, %v621_v43  ;;  %v625_v41 = vmul.f32 %v1238_v44, %v621_v43 }
 0x128   :  { %v626_v47 = vmul.f32 %v833_v58, %v622_v40  ;;  %v627_v54 = vmul.f32 %v834_v19, %v623_v51  ;;  %v628_v0 = vmul.f32 %v835_v46, %v624_v37  ;;  %v629_v38 = vmul.f32 %v836_v4, %v625_v41 }
 0x12a   :  { %v630_v36 = vadd.f32 %v626_v47, %v568_v16  ;;  %v631_v55 = vadd.f32 %v627_v54, %v569_v62  ;;  %v632_v1 = vadd.f32 %v628_v0, %v570_v27  ;;  %v633_v44 = vadd.f32 %v629_v38, %v571_v8 }
 0x12d   :  { %v820_v42 = vpop.eup %819 }
 0x12e   :  { %v681_v10 = vmul.f32 %v820_v42, %v679_v29  ;;  %v837_v29 = vld [vmem:[#allocation5 + $0x18] sm:$0xff] }
 0x130   :  { %v682_v12 = vsub.f32 2.0, %v681_v10 }
 0x132   :  { %v683_v52 = vmul.f32 %v820_v42, %v682_v12 }
 0x134   :  { %v684_v25 = vmul.f32 %v1242_v9, %v683_v52  ;;  %v685_v56 = vmul.f32 %v1244_v33, %v683_v52  ;;  %v686_v13 = vmul.f32 %v1246_v57, %v683_v52  ;;  %v687_v14 = vmul.f32 %v1250_v61, %v683_v52 }
 0x136   :  { %v688_v24 = vmul.f32 %v837_v29, %v684_v25  ;;  %v689_v20 = vmul.f32 %v838_v2, %v685_v56  ;;  %v690_v26 = vmul.f32 %v839_v31, %v686_v13  ;;  %v691_v17 = vmul.f32 %v840_v32, %v687_v14 }
 0x138   :  { %v692_v45 = vadd.f32 %v688_v24, %v630_v36  ;;  %v693_v18 = vadd.f32 %v689_v20, %v631_v55  ;;  %v694_v35 = vadd.f32 %v690_v26, %v632_v1  ;;  %v695_v9 = vadd.f32 %v691_v17, %v633_v44 }
 0x13a   :  { %696 = vst [vmem:[#allocation7] sm:$0xff] %v692_v45  ;;  %697 = vst [vmem:[#allocation7 + $0x8] sm:$0xff] %v693_v18 }
 0x13b   :  { %698 = vst [vmem:[#allocation7 + $0x10] sm:$0xff] %v694_v35  ;;  %699 = vst [vmem:[#allocation7 + $0x18] sm:$0xff] %v695_v9 }
 0x13c   :  { %896 = shalt.err (!%p893_p6)
}
 0x13d   :  { %s897_s12 = scalar_lea.hbm %s1287_s2, 512 }
 0x13e   :  { %p898_p7 = scmp.ne.s32.totalorder %s1287_s2, %s897_s12  ;;  %p901_p8 = scmp.lt.u32.totalorder %s897_s12, %s1287_s2 }
 0x140   :  { %p903_p9 = pnand %p901_p8, %p898_p7 }
 0x142   :  { %906 = shalt.err (!%p903_p9)
}
 0x143   :  { %711 = dma.vmem_to_hbm [thread:$0]  %s706_s8, 512, %s1287_s2, [#allocation4], %s914_s19, %s914_s19, %s915_s20  }
 0x144   :  { %911 = dma.done.wait [#allocation4], 512  }
 0x145   :  { %912 = vsyncadd [#allocation4], 4294966784 }
 0x146   :  { %715 = vsyncpa [#allocation3], 1 }
 0x147   :  { %716 = vsyncpa [#allocation6], 1 }
 0x148   :  { %717 = vsyncpa [#allocation4], 1 }

</bundles_post_ra>
